<compile_context>
chip_gen: v6e
topology: v6e:2x2x1
jax: 0.10.0
libtpu: 0.0.40
codegen_flags: <defaults>
</compile_context>

<pallas_src>
import functools

import numpy as np
import jax
import jax.numpy as jnp
from jax import lax
from jax.experimental import pallas as pl
from jax.experimental.pallas import tpu as pltpu

PARAMS_PER_LAYER = 4  # fused: w_ih_rzn (in_l,3H), w_hh_rzn (H,3H), b_gi (1,3H), b_gh (1,3H)


def make_grunn_kernel(num_layers, seq_len, batch_p, hid):
    P = PARAMS_PER_LAYER
    H3 = 3 * hid

    def kernel(*refs):
        x_ref = refs[0]                          # (T*Bp, I)   time-major, flattened
        h0_ref = refs[1]                         # (L, Bp, H)
        layer_refs = refs[2:2 + P * num_layers]
        out_ref = refs[2 + P * num_layers]       # (T*Bp, H)   last-layer hidden states
        gi0_buf = refs[3 + P * num_layers]       # scratch (T*Bp, 3H) fused layer-0 gi

        # Load fused weights; hoist bias broadcasts out of the unrolled loop.
        w_ih = [layer_refs[P * l + 0][...] for l in range(num_layers)]
        w_hh = [layer_refs[P * l + 1][...] for l in range(num_layers)]
        b_gi_b = [None] + [
            jnp.broadcast_to(layer_refs[P * l + 2][...], (batch_p, H3))
            for l in range(1, num_layers)
        ]
        b_gh_b = [
            jnp.broadcast_to(layer_refs[P * l + 3][...], (batch_p, H3))
            for l in range(num_layers)
        ]

        # ---- hoisted layer-0 input projection: ONE batched matmul (all gates,
        #      all timesteps) off the serial chain; bias included. ----
        gi0_buf[...] = (
            jnp.dot(x_ref[...], w_ih[0], preferred_element_type=jnp.float32)
            + layer_refs[2][...]
        )

        # ---- fully-unrolled layer-wavefront recurrence (PyTorch gate order r,z,n).
        #      Layer l's per-step input is a value carried from layer l-1, so the
        #      dependence graph is T+L-1 serial (matmul + gates) groups, not T*L.
        hs = [h0_ref[l] for l in range(num_layers)]   # (Bp, H) values
        pending = [None] * (num_layers + 1)           # pending[l]: layer l-1 output for
                                                      # layer l's next timestep
        for wt in range(seq_len + num_layers - 1):
            # descending l so layer l reads pending[l] before layer l-1 overwrites it
            for l in range(num_layers - 1, -1, -1):
                t = wt - l
                if t < 0 or t >= seq_len:
                    continue
                if l == 0:
                    # aligned (multiple-of-8 sublane) slice of the fused gi buffer
                    gi = gi0_buf[pl.ds(t * batch_p, batch_p), :]
                else:
                    gi = jnp.dot(pending[l], w_ih[l],
                                 preferred_element_type=jnp.float32) + b_gi_b[l]
                # single fused h-dependent matmul per step (r|z|n in lanes 0:3H);
                # b_gh_b = [0, 0, b_hh_n] so gh[:, 2H:] already carries b_hh_n.
                gh = jnp.dot(hs[l], w_hh[l],
                             preferred_element_type=jnp.float32) + b_gh_b[l]
                rz = jax.nn.sigmoid(gi[:, :2 * hid] + gh[:, :2 * hid])
                n = jnp.tanh(gi[:, 2 * hid:] + rz[:, :hid] * gh[:, 2 * hid:])
                h_new = n + rz[:, hid:] * (hs[l] - n)     # == (1-z)*n + z*h
                hs[l] = h_new
                if l == num_layers - 1:
                    out_ref[pl.ds(t * batch_p, batch_p), :] = h_new
                else:
                    pending[l + 1] = h_new

    return kernel


@functools.partial(jax.jit, static_argnames=("symmetric", "allow_negative_values"))
def grunn_pallas(params, inputs, hidden_state, *, symmetric=True,
                 allow_negative_values=False):
    B, T, I = inputs.shape
    L, _, H = hidden_state.shape
    B2 = 2 * B
    Bp = ((B2 + 7) // 8) * 8    # pad batch to a multiple of 8 sublanes

    # x_ = inputs * [[-1, 1]]; run both passes in one kernel (2B rows), pad to Bp.
    sign = jnp.asarray([[-1.0, 1.0]], dtype=inputs.dtype)
    x_cat = jnp.concatenate([inputs, inputs * sign], axis=0)          # (2B, T, I)
    x_cat = jnp.pad(x_cat, ((0, Bp - B2), (0, 0), (0, 0)))            # (Bp, T, I)
    x_flat = jnp.transpose(x_cat, (1, 0, 2)).reshape(T * Bp, I)       # (T*Bp, I)
    h0 = jnp.concatenate([hidden_state, hidden_state], axis=1)        # (L, 2B, H)
    h0 = jnp.pad(h0, ((0, 0), (0, Bp - B2), (0, 0)))                  # (L, Bp, H)

    # Wrapper-side algebra (exact): fold encoder into layer-0 input weights, keep
    # gates fused as one (., 3H) block, pre-add b_hh for r/z into b_gi, and keep
    # b_hh_n separate (it is scaled by r) as a lane-padded b_gh = [0, 0, b_hh_n].
    flat = []
    for l, (w_ih_t, w_hh_t, b_ih, b_hh) in enumerate(params["layers"]):
        if l == 0:
            b_ih = params["enc_b"] @ w_ih_t + b_ih                    # (1, 3H)
            w_ih_t = params["enc_w_t"] @ w_ih_t                       # (I, 3H)
        zeros_h = jnp.zeros((1, H), dtype=b_hh.dtype)
        b_gi = b_ih + jnp.concatenate([b_hh[:, :2 * H], zeros_h], axis=1)
        b_gh = jnp.concatenate([jnp.zeros((1, 2 * H), b_hh.dtype), b_hh[:, 2 * H:]],
                               axis=1)
        flat += [w_ih_t, w_hh_t, b_gi, b_gh]

    kernel = make_grunn_kernel(L, T, Bp, H)
    n_in = 2 + PARAMS_PER_LAYER * L
    vmem_spec = pl.BlockSpec(memory_space=pltpu.MemorySpace.VMEM)

    h_last = pl.pallas_call(
        kernel,
        out_shape=jax.ShapeDtypeStruct((T * Bp, H), jnp.float32),
        in_specs=[vmem_spec] * n_in,
        out_specs=vmem_spec,
        scratch_shapes=[pltpu.VMEM((T * Bp, 3 * H), jnp.float32)],
    )(x_flat, h0, *flat)

    # Decoder + symmetric fold + sigmoid stay in XLA (O=2 would force masked
    # partial stores in-kernel); everything fuses under this jit around the call.
    h_last = h_last.reshape(T, Bp, H)[:, :B2]                         # (T, 2B, H)
    out = jnp.einsum("tbh,ho->bto", h_last, params["dec_w_t"]) + params["dec_b"][0]
    o, o_neg = out[:B], out[B:]
    if symmetric:
        o = (o + jnp.flip(o_neg, axis=2)) / 2.0
    if not allow_negative_values:
        o = jax.nn.sigmoid(o)
    return o


def init_params(key, input_size, encoder_size, state_size, output_size, num_layers):
    # Deterministic synthetic params; weights stored pre-transposed.
    # PyTorch shapes: encoder.weight (E, I), rnn.weight_ih_l{k} (3H, in_k),
    # rnn.weight_hh_l{k} (3H, H), biases (3H,), decoder.weight (O, H).
    H = state_size
    keys = jax.random.split(key, 4 + 4 * num_layers)
    k_rnn = 1.0 / np.sqrt(H)
    k_enc = 1.0 / np.sqrt(input_size)
    k_dec = 1.0 / np.sqrt(H)
    params = {
        "enc_w_t": jax.random.uniform(keys[0], (input_size, encoder_size),
                                      jnp.float32, -k_enc, k_enc),
        "enc_b": jax.random.uniform(keys[1], (1, encoder_size),
                                    jnp.float32, -k_enc, k_enc),
        "dec_w_t": jax.random.uniform(keys[2], (H, output_size),
                                      jnp.float32, -k_dec, k_dec),
        "dec_b": jax.random.uniform(keys[3], (1, output_size),
                                    jnp.float32, -k_dec, k_dec),
        "layers": [],
    }
    for l in range(num_layers):
        in_l = encoder_size if l == 0 else H
        kk = keys[4 + 4 * l: 8 + 4 * l]
        params["layers"].append((
            jax.random.uniform(kk[0], (in_l, 3 * H), jnp.float32, -k_rnn, k_rnn),
            jax.random.uniform(kk[1], (H, 3 * H), jnp.float32, -k_rnn, k_rnn),
            jax.random.uniform(kk[2], (1, 3 * H), jnp.float32, -k_rnn, k_rnn),
            jax.random.uniform(kk[3], (1, 3 * H), jnp.float32, -k_rnn, k_rnn),
        ))
    return params


def grunn_reference(params, inputs, hidden_state, *, symmetric=True,
                    allow_negative_values=False):
    """Pure-JAX reference mirroring the PyTorch forward() (un-folded encoder)."""
    L, _, H = hidden_state.shape

    def run(x):
        layer_in = jnp.einsum("bti,ie->bte", x, params["enc_w_t"]) + params["enc_b"][0]
        for l in range(L):
            w_ih_t, w_hh_t, b_ih, b_hh = params["layers"][l]

            def step(hc, x_t):
                gi = x_t @ w_ih_t + b_ih
                gh = hc @ w_hh_t + b_hh
                r = jax.nn.sigmoid(gi[:, :H] + gh[:, :H])
                z = jax.nn.sigmoid(gi[:, H:2 * H] + gh[:, H:2 * H])
                n = jnp.tanh(gi[:, 2 * H:] + r * gh[:, 2 * H:])
                hn = (1.0 - z) * n + z * hc
                return hn, hn

            _, outs = lax.scan(step, hidden_state[l], jnp.transpose(layer_in, (1, 0, 2)))
            layer_in = jnp.transpose(outs, (1, 0, 2))
        return layer_in @ params["dec_w_t"] + params["dec_b"][0]

    sign = jnp.asarray([[-1.0, 1.0]], dtype=inputs.dtype)
    o = run(inputs)
    o_neg = run(inputs * sign)
    if symmetric:
        o = (o + jnp.flip(o_neg, axis=2)) / 2.0
    if not allow_negative_values:
        o = jax.nn.sigmoid(o)
    return o


if __name__ == "__main__":
    B, T = 2, 8
    INPUT_SIZE, ENC_SIZE, STATE_SIZE, OUT_SIZE, NUM_LAYERS = 2, 8, 32, 2, 2

    key = jax.random.PRNGKey(0)
    kp, kx = jax.random.split(key)
    params = init_params(kp, INPUT_SIZE, ENC_SIZE, STATE_SIZE, OUT_SIZE, NUM_LAYERS)
    inputs = jax.random.normal(kx, (B, T, INPUT_SIZE), dtype=jnp.float32)
    hidden = jnp.zeros((NUM_LAYERS, B, STATE_SIZE), dtype=jnp.float32)  # init_hidden

    out = grunn_pallas(params, inputs, hidden,
                       symmetric=True, allow_negative_values=False)
    out = jax.block_until_ready(out)

    ref = grunn_reference(params, inputs, hidden,
                          symmetric=True, allow_negative_values=False)
    ref = jax.block_until_ready(ref)

    # Tightened from 1e-2 -> 1e-4 (f32 end to end; only accumulation-order and
    # transcendental-approximation differences remain).
    np.testing.assert_allclose(np.asarray(out), np.asarray(ref), rtol=1e-4, atol=1e-4)
    print("KERNEL_OK")
</pallas_src>

<mosaic_0001>
module attributes {stable_mosaic.version = 11 : i64} {
  func.func @kernel(%arg0: memref<64x2xf32, #tpu.memory_space<vmem>>, %arg1: memref<2x8x32xf32, #tpu.memory_space<vmem>>, %arg2: memref<2x96xf32, #tpu.memory_space<vmem>>, %arg3: memref<32x96xf32, #tpu.memory_space<vmem>>, %arg4: memref<1x96xf32, #tpu.memory_space<vmem>>, %arg5: memref<1x96xf32, #tpu.memory_space<vmem>>, %arg6: memref<32x96xf32, #tpu.memory_space<vmem>>, %arg7: memref<32x96xf32, #tpu.memory_space<vmem>>, %arg8: memref<1x96xf32, #tpu.memory_space<vmem>>, %arg9: memref<1x96xf32, #tpu.memory_space<vmem>>, %arg10: memref<64x32xf32, #tpu.memory_space<vmem>>, %arg11: memref<64x96xf32, #tpu.memory_space<vmem>>) attributes {dimension_semantics = [], scalar_prefetch = 0 : i64, scratch_operands = 1 : i64, tpu.core_type = #tpu.core_type<tc>} {
    %c0 = arith.constant 0 : index
    %c0_0 = arith.constant 0 : index
    %0 = vector.load %arg2[%c0, %c0_0] : memref<2x96xf32, #tpu.memory_space<vmem>>, vector<2x96xf32>
    %c0_1 = arith.constant 0 : index
    %c0_2 = arith.constant 0 : index
    %1 = vector.load %arg6[%c0_1, %c0_2] : memref<32x96xf32, #tpu.memory_space<vmem>>, vector<32x96xf32>
    %c0_3 = arith.constant 0 : index
    %c0_4 = arith.constant 0 : index
    %2 = vector.load %arg3[%c0_3, %c0_4] : memref<32x96xf32, #tpu.memory_space<vmem>>, vector<32x96xf32>
    %c0_5 = arith.constant 0 : index
    %c0_6 = arith.constant 0 : index
    %3 = vector.load %arg7[%c0_5, %c0_6] : memref<32x96xf32, #tpu.memory_space<vmem>>, vector<32x96xf32>
    %c0_7 = arith.constant 0 : index
    %c0_8 = arith.constant 0 : index
    %4 = vector.load %arg8[%c0_7, %c0_8] : memref<1x96xf32, #tpu.memory_space<vmem>>, vector<1x96xf32>
    %5 = vector.shape_cast %4 : vector<1x96xf32> to vector<1x96xf32>
    %6 = vector.broadcast %5 : vector<1x96xf32> to vector<8x96xf32>
    %c0_9 = arith.constant 0 : index
    %c0_10 = arith.constant 0 : index
    %7 = vector.load %arg5[%c0_9, %c0_10] : memref<1x96xf32, #tpu.memory_space<vmem>>, vector<1x96xf32>
    %8 = vector.shape_cast %7 : vector<1x96xf32> to vector<1x96xf32>
    %9 = vector.broadcast %8 : vector<1x96xf32> to vector<8x96xf32>
    %c0_11 = arith.constant 0 : index
    %c0_12 = arith.constant 0 : index
    %10 = vector.load %arg9[%c0_11, %c0_12] : memref<1x96xf32, #tpu.memory_space<vmem>>, vector<1x96xf32>
    %11 = vector.shape_cast %10 : vector<1x96xf32> to vector<1x96xf32>
    %12 = vector.broadcast %11 : vector<1x96xf32> to vector<8x96xf32>
    %c0_13 = arith.constant 0 : index
    %c0_14 = arith.constant 0 : index
    %13 = vector.load %arg0[%c0_13, %c0_14] : memref<64x2xf32, #tpu.memory_space<vmem>>, vector<64x2xf32>
    %cst = arith.constant dense<0.000000e+00> : vector<64x96xf32>
    %14 = tpu.matmul %13, %0, %cst {dimension_numbers = #tpu.dot_dimension_numbers<[1], [0], [0], [1], [0, 0, 1, 1], [], []>} : vector<64x2xf32>, vector<2x96xf32>, vector<64x96xf32> -> vector<64x96xf32>
    %c0_15 = arith.constant 0 : index
    %c0_16 = arith.constant 0 : index
    %15 = vector.load %arg4[%c0_15, %c0_16] : memref<1x96xf32, #tpu.memory_space<vmem>>, vector<1x96xf32>
    %16 = vector.broadcast %15 : vector<1x96xf32> to vector<64x96xf32>
    %17 = arith.addf %14, %16 : vector<64x96xf32>
    %c0_17 = arith.constant 0 : index
    %c0_18 = arith.constant 0 : index
    %18 = vector.load %arg11[%c0_17, %c0_18] : memref<64x96xf32, #tpu.memory_space<vmem>>, vector<64x96xf32>
    tpu.vector_store %arg11[%c0_17, %c0_18], %17 {strides = array<i32>} : memref<64x96xf32, #tpu.memory_space<vmem>>, vector<64x96xf32>,
    %c0_19 = arith.constant 0 : index
    %c0_20 = arith.constant 0 : index
    %c0_21 = arith.constant 0 : index
    %19 = vector.load %arg1[%c0_19, %c0_20, %c0_21] : memref<2x8x32xf32, #tpu.memory_space<vmem>>, vector<1x8x32xf32>
    %20 = vector.shape_cast %19 : vector<1x8x32xf32> to vector<8x32xf32>
    %c1 = arith.constant 1 : index
    %c0_22 = arith.constant 0 : index
    %c0_23 = arith.constant 0 : index
    %21 = vector.load %arg1[%c1, %c0_22, %c0_23] : memref<2x8x32xf32, #tpu.memory_space<vmem>>, vector<1x8x32xf32>
    %22 = vector.shape_cast %21 : vector<1x8x32xf32> to vector<8x32xf32>
    %c0_24 = arith.constant 0 : index
    %c0_25 = arith.constant 0 : index
    %23 = vector.load %arg11[%c0_24, %c0_25] : memref<64x96xf32, #tpu.memory_space<vmem>>, vector<8x96xf32>
    %cst_26 = arith.constant dense<0.000000e+00> : vector<8x96xf32>
    %24 = tpu.matmul %20, %2, %cst_26 {dimension_numbers = #tpu.dot_dimension_numbers<[1], [0], [0], [1], [0, 0, 1, 1], [], []>} : vector<8x32xf32>, vector<32x96xf32>, vector<8x96xf32> -> vector<8x96xf32>
    %25 = arith.addf %24, %9 : vector<8x96xf32>
    %26 = vector.extract_strided_slice %23 {offsets = [0, 0], sizes = [8, 64], strides = [1, 1]} : vector<8x96xf32> to vector<8x64xf32>
    %27 = vector.extract_strided_slice %25 {offsets = [0, 0], sizes = [8, 64], strides = [1, 1]} : vector<8x96xf32> to vector<8x64xf32>
    %28 = arith.addf %26, %27 : vector<8x64xf32>
    %29 = arith.negf %28 : vector<8x64xf32>
    %30 = math.exp %29 : vector<8x64xf32>
    %cst_27 = arith.constant 1.000000e+00 : f32
    %31 = vector.broadcast %cst_27 : f32 to vector<8x64xf32>
    %32 = arith.addf %31, %30 : vector<8x64xf32>
    %33 = arith.divf %31, %32 : vector<8x64xf32>
    %34 = vector.extract_strided_slice %23 {offsets = [0, 64], sizes = [8, 32], strides = [1, 1]} : vector<8x96xf32> to vector<8x32xf32>
    %35 = vector.extract_strided_slice %33 {offsets = [0, 0], sizes = [8, 32], strides = [1, 1]} : vector<8x64xf32> to vector<8x32xf32>
    %36 = vector.extract_strided_slice %25 {offsets = [0, 64], sizes = [8, 32], strides = [1, 1]} : vector<8x96xf32> to vector<8x32xf32>
    %37 = arith.mulf %35, %36 : vector<8x32xf32>
    %38 = arith.addf %34, %37 : vector<8x32xf32>
    %39 = math.tanh %38 : vector<8x32xf32>
    %40 = vector.extract_strided_slice %33 {offsets = [0, 32], sizes = [8, 32], strides = [1, 1]} : vector<8x64xf32> to vector<8x32xf32>
    %41 = arith.subf %20, %39 : vector<8x32xf32>
    %42 = arith.mulf %40, %41 : vector<8x32xf32>
    %43 = arith.addf %39, %42 : vector<8x32xf32>
    %cst_28 = arith.constant dense<0.000000e+00> : vector<8x96xf32>
    %44 = tpu.matmul %43, %1, %cst_28 {dimension_numbers = #tpu.dot_dimension_numbers<[1], [0], [0], [1], [0, 0, 1, 1], [], []>} : vector<8x32xf32>, vector<32x96xf32>, vector<8x96xf32> -> vector<8x96xf32>
    %45 = arith.addf %44, %6 : vector<8x96xf32>
    %cst_29 = arith.constant dense<0.000000e+00> : vector<8x96xf32>
    %46 = tpu.matmul %22, %3, %cst_29 {dimension_numbers = #tpu.dot_dimension_numbers<[1], [0], [0], [1], [0, 0, 1, 1], [], []>} : vector<8x32xf32>, vector<32x96xf32>, vector<8x96xf32> -> vector<8x96xf32>
    %47 = arith.addf %46, %12 : vector<8x96xf32>
    %48 = vector.extract_strided_slice %45 {offsets = [0, 0], sizes = [8, 64], strides = [1, 1]} : vector<8x96xf32> to vector<8x64xf32>
    %49 = vector.extract_strided_slice %47 {offsets = [0, 0], sizes = [8, 64], strides = [1, 1]} : vector<8x96xf32> to vector<8x64xf32>
    %50 = arith.addf %48, %49 : vector<8x64xf32>
    %51 = arith.negf %50 : vector<8x64xf32>
    %52 = math.exp %51 : vector<8x64xf32>
    %cst_30 = arith.constant 1.000000e+00 : f32
    %53 = vector.broadcast %cst_30 : f32 to vector<8x64xf32>
    %54 = arith.addf %53, %52 : vector<8x64xf32>
    %55 = arith.divf %53, %54 : vector<8x64xf32>
    %56 = vector.extract_strided_slice %45 {offsets = [0, 64], sizes = [8, 32], strides = [1, 1]} : vector<8x96xf32> to vector<8x32xf32>
    %57 = vector.extract_strided_slice %55 {offsets = [0, 0], sizes = [8, 32], strides = [1, 1]} : vector<8x64xf32> to vector<8x32xf32>
    %58 = vector.extract_strided_slice %47 {offsets = [0, 64], sizes = [8, 32], strides = [1, 1]} : vector<8x96xf32> to vector<8x32xf32>
    %59 = arith.mulf %57, %58 : vector<8x32xf32>
    %60 = arith.addf %56, %59 : vector<8x32xf32>
    %61 = math.tanh %60 : vector<8x32xf32>
    %62 = vector.extract_strided_slice %55 {offsets = [0, 32], sizes = [8, 32], strides = [1, 1]} : vector<8x64xf32> to vector<8x32xf32>
    %63 = arith.subf %22, %61 : vector<8x32xf32>
    %64 = arith.mulf %62, %63 : vector<8x32xf32>
    %65 = arith.addf %61, %64 : vector<8x32xf32>
    %c0_31 = arith.constant 0 : index
    %c0_32 = arith.constant 0 : index
    %66 = vector.load %arg10[%c0_31, %c0_32] : memref<64x32xf32, #tpu.memory_space<vmem>>, vector<8x32xf32>
    tpu.vector_store %arg10[%c0_31, %c0_32], %65 {strides = array<i32>} : memref<64x32xf32, #tpu.memory_space<vmem>>, vector<8x32xf32>,
    %c8 = arith.constant 8 : index
    %c0_33 = arith.constant 0 : index
    %67 = vector.load %arg11[%c8, %c0_33] : memref<64x96xf32, #tpu.memory_space<vmem>>, vector<8x96xf32>
    %cst_34 = arith.constant dense<0.000000e+00> : vector<8x96xf32>
    %68 = tpu.matmul %43, %2, %cst_34 {dimension_numbers = #tpu.dot_dimension_numbers<[1], [0], [0], [1], [0, 0, 1, 1], [], []>} : vector<8x32xf32>, vector<32x96xf32>, vector<8x96xf32> -> vector<8x96xf32>
    %69 = arith.addf %68, %9 : vector<8x96xf32>
    %70 = vector.extract_strided_slice %67 {offsets = [0, 0], sizes = [8, 64], strides = [1, 1]} : vector<8x96xf32> to vector<8x64xf32>
    %71 = vector.extract_strided_slice %69 {offsets = [0, 0], sizes = [8, 64], strides = [1, 1]} : vector<8x96xf32> to vector<8x64xf32>
    %72 = arith.addf %70, %71 : vector<8x64xf32>
    %73 = arith.negf %72 : vector<8x64xf32>
    %74 = math.exp %73 : vector<8x64xf32>
    %cst_35 = arith.constant 1.000000e+00 : f32
    %75 = vector.broadcast %cst_35 : f32 to vector<8x64xf32>
    %76 = arith.addf %75, %74 : vector<8x64xf32>
    %77 = arith.divf %75, %76 : vector<8x64xf32>
    %78 = vector.extract_strided_slice %67 {offsets = [0, 64], sizes = [8, 32], strides = [1, 1]} : vector<8x96xf32> to vector<8x32xf32>
    %79 = vector.extract_strided_slice %77 {offsets = [0, 0], sizes = [8, 32], strides = [1, 1]} : vector<8x64xf32> to vector<8x32xf32>
    %80 = vector.extract_strided_slice %69 {offsets = [0, 64], sizes = [8, 32], strides = [1, 1]} : vector<8x96xf32> to vector<8x32xf32>
    %81 = arith.mulf %79, %80 : vector<8x32xf32>
    %82 = arith.addf %78, %81 : vector<8x32xf32>
    %83 = math.tanh %82 : vector<8x32xf32>
    %84 = vector.extract_strided_slice %77 {offsets = [0, 32], sizes = [8, 32], strides = [1, 1]} : vector<8x64xf32> to vector<8x32xf32>
    %85 = arith.subf %43, %83 : vector<8x32xf32>
    %86 = arith.mulf %84, %85 : vector<8x32xf32>
    %87 = arith.addf %83, %86 : vector<8x32xf32>
    %cst_36 = arith.constant dense<0.000000e+00> : vector<8x96xf32>
    %88 = tpu.matmul %87, %1, %cst_36 {dimension_numbers = #tpu.dot_dimension_numbers<[1], [0], [0], [1], [0, 0, 1, 1], [], []>} : vector<8x32xf32>, vector<32x96xf32>, vector<8x96xf32> -> vector<8x96xf32>
    %89 = arith.addf %88, %6 : vector<8x96xf32>
    %cst_37 = arith.constant dense<0.000000e+00> : vector<8x96xf32>
    %90 = tpu.matmul %65, %3, %cst_37 {dimension_numbers = #tpu.dot_dimension_numbers<[1], [0], [0], [1], [0, 0, 1, 1], [], []>} : vector<8x32xf32>, vector<32x96xf32>, vector<8x96xf32> -> vector<8x96xf32>
    %91 = arith.addf %90, %12 : vector<8x96xf32>
    %92 = vector.extract_strided_slice %89 {offsets = [0, 0], sizes = [8, 64], strides = [1, 1]} : vector<8x96xf32> to vector<8x64xf32>
    %93 = vector.extract_strided_slice %91 {offsets = [0, 0], sizes = [8, 64], strides = [1, 1]} : vector<8x96xf32> to vector<8x64xf32>
    %94 = arith.addf %92, %93 : vector<8x64xf32>
    %95 = arith.negf %94 : vector<8x64xf32>
    %96 = math.exp %95 : vector<8x64xf32>
    %cst_38 = arith.constant 1.000000e+00 : f32
    %97 = vector.broadcast %cst_38 : f32 to vector<8x64xf32>
    %98 = arith.addf %97, %96 : vector<8x64xf32>
    %99 = arith.divf %97, %98 : vector<8x64xf32>
    %100 = vector.extract_strided_slice %89 {offsets = [0, 64], sizes = [8, 32], strides = [1, 1]} : vector<8x96xf32> to vector<8x32xf32>
    %101 = vector.extract_strided_slice %99 {offsets = [0, 0], sizes = [8, 32], strides = [1, 1]} : vector<8x64xf32> to vector<8x32xf32>
    %102 = vector.extract_strided_slice %91 {offsets = [0, 64], sizes = [8, 32], strides = [1, 1]} : vector<8x96xf32> to vector<8x32xf32>
    %103 = arith.mulf %101, %102 : vector<8x32xf32>
    %104 = arith.addf %100, %103 : vector<8x32xf32>
    %105 = math.tanh %104 : vector<8x32xf32>
    %106 = vector.extract_strided_slice %99 {offsets = [0, 32], sizes = [8, 32], strides = [1, 1]} : vector<8x64xf32> to vector<8x32xf32>
    %107 = arith.subf %65, %105 : vector<8x32xf32>
    %108 = arith.mulf %106, %107 : vector<8x32xf32>
    %109 = arith.addf %105, %108 : vector<8x32xf32>
    %c8_39 = arith.constant 8 : index
    %c0_40 = arith.constant 0 : index
    %110 = vector.load %arg10[%c8_39, %c0_40] : memref<64x32xf32, #tpu.memory_space<vmem>>, vector<8x32xf32>
    tpu.vector_store %arg10[%c8_39, %c0_40], %109 {strides = array<i32>} : memref<64x32xf32, #tpu.memory_space<vmem>>, vector<8x32xf32>,
    %c16 = arith.constant 16 : index
    %c0_41 = arith.constant 0 : index
    %111 = vector.load %arg11[%c16, %c0_41] : memref<64x96xf32, #tpu.memory_space<vmem>>, vector<8x96xf32>
    %cst_42 = arith.constant dense<0.000000e+00> : vector<8x96xf32>
    %112 = tpu.matmul %87, %2, %cst_42 {dimension_numbers = #tpu.dot_dimension_numbers<[1], [0], [0], [1], [0, 0, 1, 1], [], []>} : vector<8x32xf32>, vector<32x96xf32>, vector<8x96xf32> -> vector<8x96xf32>
    %113 = arith.addf %112, %9 : vector<8x96xf32>
    %114 = vector.extract_strided_slice %111 {offsets = [0, 0], sizes = [8, 64], strides = [1, 1]} : vector<8x96xf32> to vector<8x64xf32>
    %115 = vector.extract_strided_slice %113 {offsets = [0, 0], sizes = [8, 64], strides = [1, 1]} : vector<8x96xf32> to vector<8x64xf32>
    %116 = arith.addf %114, %115 : vector<8x64xf32>
    %117 = arith.negf %116 : vector<8x64xf32>
    %118 = math.exp %117 : vector<8x64xf32>
    %cst_43 = arith.constant 1.000000e+00 : f32
    %119 = vector.broadcast %cst_43 : f32 to vector<8x64xf32>
    %120 = arith.addf %119, %118 : vector<8x64xf32>
    %121 = arith.divf %119, %120 : vector<8x64xf32>
    %122 = vector.extract_strided_slice %111 {offsets = [0, 64], sizes = [8, 32], strides = [1, 1]} : vector<8x96xf32> to vector<8x32xf32>
    %123 = vector.extract_strided_slice %121 {offsets = [0, 0], sizes = [8, 32], strides = [1, 1]} : vector<8x64xf32> to vector<8x32xf32>
    %124 = vector.extract_strided_slice %113 {offsets = [0, 64], sizes = [8, 32], strides = [1, 1]} : vector<8x96xf32> to vector<8x32xf32>
    %125 = arith.mulf %123, %124 : vector<8x32xf32>
    %126 = arith.addf %122, %125 : vector<8x32xf32>
    %127 = math.tanh %126 : vector<8x32xf32>
    %128 = vector.extract_strided_slice %121 {offsets = [0, 32], sizes = [8, 32], strides = [1, 1]} : vector<8x64xf32> to vector<8x32xf32>
    %129 = arith.subf %87, %127 : vector<8x32xf32>
    %130 = arith.mulf %128, %129 : vector<8x32xf32>
    %131 = arith.addf %127, %130 : vector<8x32xf32>
    %cst_44 = arith.constant dense<0.000000e+00> : vector<8x96xf32>
    %132 = tpu.matmul %131, %1, %cst_44 {dimension_numbers = #tpu.dot_dimension_numbers<[1], [0], [0], [1], [0, 0, 1, 1], [], []>} : vector<8x32xf32>, vector<32x96xf32>, vector<8x96xf32> -> vector<8x96xf32>
    %133 = arith.addf %132, %6 : vector<8x96xf32>
    %cst_45 = arith.constant dense<0.000000e+00> : vector<8x96xf32>
    %134 = tpu.matmul %109, %3, %cst_45 {dimension_numbers = #tpu.dot_dimension_numbers<[1], [0], [0], [1], [0, 0, 1, 1], [], []>} : vector<8x32xf32>, vector<32x96xf32>, vector<8x96xf32> -> vector<8x96xf32>
    %135 = arith.addf %134, %12 : vector<8x96xf32>
    %136 = vector.extract_strided_slice %133 {offsets = [0, 0], sizes = [8, 64], strides = [1, 1]} : vector<8x96xf32> to vector<8x64xf32>
    %137 = vector.extract_strided_slice %135 {offsets = [0, 0], sizes = [8, 64], strides = [1, 1]} : vector<8x96xf32> to vector<8x64xf32>
    %138 = arith.addf %136, %137 : vector<8x64xf32>
    %139 = arith.negf %138 : vector<8x64xf32>
    %140 = math.exp %139 : vector<8x64xf32>
    %cst_46 = arith.constant 1.000000e+00 : f32
    %141 = vector.broadcast %cst_46 : f32 to vector<8x64xf32>
    %142 = arith.addf %141, %140 : vector<8x64xf32>
    %143 = arith.divf %141, %142 : vector<8x64xf32>
    %144 = vector.extract_strided_slice %133 {offsets = [0, 64], sizes = [8, 32], strides = [1, 1]} : vector<8x96xf32> to vector<8x32xf32>
    %145 = vector.extract_strided_slice %143 {offsets = [0, 0], sizes = [8, 32], strides = [1, 1]} : vector<8x64xf32> to vector<8x32xf32>
    %146 = vector.extract_strided_slice %135 {offsets = [0, 64], sizes = [8, 32], strides = [1, 1]} : vector<8x96xf32> to vector<8x32xf32>
    %147 = arith.mulf %145, %146 : vector<8x32xf32>
    %148 = arith.addf %144, %147 : vector<8x32xf32>
    %149 = math.tanh %148 : vector<8x32xf32>
    %150 = vector.extract_strided_slice %143 {offsets = [0, 32], sizes = [8, 32], strides = [1, 1]} : vector<8x64xf32> to vector<8x32xf32>
    %151 = arith.subf %109, %149 : vector<8x32xf32>
    %152 = arith.mulf %150, %151 : vector<8x32xf32>
    %153 = arith.addf %149, %152 : vector<8x32xf32>
    %c16_47 = arith.constant 16 : index
    %c0_48 = arith.constant 0 : index
    %154 = vector.load %arg10[%c16_47, %c0_48] : memref<64x32xf32, #tpu.memory_space<vmem>>, vector<8x32xf32>
    tpu.vector_store %arg10[%c16_47, %c0_48], %153 {strides = array<i32>} : memref<64x32xf32, #tpu.memory_space<vmem>>, vector<8x32xf32>,
    %c24 = arith.constant 24 : index
    %c0_49 = arith.constant 0 : index
    %155 = vector.load %arg11[%c24, %c0_49] : memref<64x96xf32, #tpu.memory_space<vmem>>, vector<8x96xf32>
    %cst_50 = arith.constant dense<0.000000e+00> : vector<8x96xf32>
    %156 = tpu.matmul %131, %2, %cst_50 {dimension_numbers = #tpu.dot_dimension_numbers<[1], [0], [0], [1], [0, 0, 1, 1], [], []>} : vector<8x32xf32>, vector<32x96xf32>, vector<8x96xf32> -> vector<8x96xf32>
    %157 = arith.addf %156, %9 : vector<8x96xf32>
    %158 = vector.extract_strided_slice %155 {offsets = [0, 0], sizes = [8, 64], strides = [1, 1]} : vector<8x96xf32> to vector<8x64xf32>
    %159 = vector.extract_strided_slice %157 {offsets = [0, 0], sizes = [8, 64], strides = [1, 1]} : vector<8x96xf32> to vector<8x64xf32>
    %160 = arith.addf %158, %159 : vector<8x64xf32>
    %161 = arith.negf %160 : vector<8x64xf32>
    %162 = math.exp %161 : vector<8x64xf32>
    %cst_51 = arith.constant 1.000000e+00 : f32
    %163 = vector.broadcast %cst_51 : f32 to vector<8x64xf32>
    %164 = arith.addf %163, %162 : vector<8x64xf32>
    %165 = arith.divf %163, %164 : vector<8x64xf32>
    %166 = vector.extract_strided_slice %155 {offsets = [0, 64], sizes = [8, 32], strides = [1, 1]} : vector<8x96xf32> to vector<8x32xf32>
    %167 = vector.extract_strided_slice %165 {offsets = [0, 0], sizes = [8, 32], strides = [1, 1]} : vector<8x64xf32> to vector<8x32xf32>
    %168 = vector.extract_strided_slice %157 {offsets = [0, 64], sizes = [8, 32], strides = [1, 1]} : vector<8x96xf32> to vector<8x32xf32>
    %169 = arith.mulf %167, %168 : vector<8x32xf32>
    %170 = arith.addf %166, %169 : vector<8x32xf32>
    %171 = math.tanh %170 : vector<8x32xf32>
    %172 = vector.extract_strided_slice %165 {offsets = [0, 32], sizes = [8, 32], strides = [1, 1]} : vector<8x64xf32> to vector<8x32xf32>
    %173 = arith.subf %131, %171 : vector<8x32xf32>
    %174 = arith.mulf %172, %173 : vector<8x32xf32>
    %175 = arith.addf %171, %174 : vector<8x32xf32>
    %cst_52 = arith.constant dense<0.000000e+00> : vector<8x96xf32>
    %176 = tpu.matmul %175, %1, %cst_52 {dimension_numbers = #tpu.dot_dimension_numbers<[1], [0], [0], [1], [0, 0, 1, 1], [], []>} : vector<8x32xf32>, vector<32x96xf32>, vector<8x96xf32> -> vector<8x96xf32>
    %177 = arith.addf %176, %6 : vector<8x96xf32>
    %cst_53 = arith.constant dense<0.000000e+00> : vector<8x96xf32>
    %178 = tpu.matmul %153, %3, %cst_53 {dimension_numbers = #tpu.dot_dimension_numbers<[1], [0], [0], [1], [0, 0, 1, 1], [], []>} : vector<8x32xf32>, vector<32x96xf32>, vector<8x96xf32> -> vector<8x96xf32>
    %179 = arith.addf %178, %12 : vector<8x96xf32>
    %180 = vector.extract_strided_slice %177 {offsets = [0, 0], sizes = [8, 64], strides = [1, 1]} : vector<8x96xf32> to vector<8x64xf32>
    %181 = vector.extract_strided_slice %179 {offsets = [0, 0], sizes = [8, 64], strides = [1, 1]} : vector<8x96xf32> to vector<8x64xf32>
    %182 = arith.addf %180, %181 : vector<8x64xf32>
    %183 = arith.negf %182 : vector<8x64xf32>
    %184 = math.exp %183 : vector<8x64xf32>
    %cst_54 = arith.constant 1.000000e+00 : f32
    %185 = vector.broadcast %cst_54 : f32 to vector<8x64xf32>
    %186 = arith.addf %185, %184 : vector<8x64xf32>
    %187 = arith.divf %185, %186 : vector<8x64xf32>
    %188 = vector.extract_strided_slice %177 {offsets = [0, 64], sizes = [8, 32], strides = [1, 1]} : vector<8x96xf32> to vector<8x32xf32>
    %189 = vector.extract_strided_slice %187 {offsets = [0, 0], sizes = [8, 32], strides = [1, 1]} : vector<8x64xf32> to vector<8x32xf32>
    %190 = vector.extract_strided_slice %179 {offsets = [0, 64], sizes = [8, 32], strides = [1, 1]} : vector<8x96xf32> to vector<8x32xf32>
    %191 = arith.mulf %189, %190 : vector<8x32xf32>
    %192 = arith.addf %188, %191 : vector<8x32xf32>
    %193 = math.tanh %192 : vector<8x32xf32>
    %194 = vector.extract_strided_slice %187 {offsets = [0, 32], sizes = [8, 32], strides = [1, 1]} : vector<8x64xf32> to vector<8x32xf32>
    %195 = arith.subf %153, %193 : vector<8x32xf32>
    %196 = arith.mulf %194, %195 : vector<8x32xf32>
    %197 = arith.addf %193, %196 : vector<8x32xf32>
    %c24_55 = arith.constant 24 : index
    %c0_56 = arith.constant 0 : index
    %198 = vector.load %arg10[%c24_55, %c0_56] : memref<64x32xf32, #tpu.memory_space<vmem>>, vector<8x32xf32>
    tpu.vector_store %arg10[%c24_55, %c0_56], %197 {strides = array<i32>} : memref<64x32xf32, #tpu.memory_space<vmem>>, vector<8x32xf32>,
    %c32 = arith.constant 32 : index
    %c0_57 = arith.constant 0 : index
    %199 = vector.load %arg11[%c32, %c0_57] : memref<64x96xf32, #tpu.memory_space<vmem>>, vector<8x96xf32>
    %cst_58 = arith.constant dense<0.000000e+00> : vector<8x96xf32>
    %200 = tpu.matmul %175, %2, %cst_58 {dimension_numbers = #tpu.dot_dimension_numbers<[1], [0], [0], [1], [0, 0, 1, 1], [], []>} : vector<8x32xf32>, vector<32x96xf32>, vector<8x96xf32> -> vector<8x96xf32>
    %201 = arith.addf %200, %9 : vector<8x96xf32>
    %202 = vector.extract_strided_slice %199 {offsets = [0, 0], sizes = [8, 64], strides = [1, 1]} : vector<8x96xf32> to vector<8x64xf32>
    %203 = vector.extract_strided_slice %201 {offsets = [0, 0], sizes = [8, 64], strides = [1, 1]} : vector<8x96xf32> to vector<8x64xf32>
    %204 = arith.addf %202, %203 : vector<8x64xf32>
    %205 = arith.negf %204 : vector<8x64xf32>
    %206 = math.exp %205 : vector<8x64xf32>
    %cst_59 = arith.constant 1.000000e+00 : f32
    %207 = vector.broadcast %cst_59 : f32 to vector<8x64xf32>
    %208 = arith.addf %207, %206 : vector<8x64xf32>
    %209 = arith.divf %207, %208 : vector<8x64xf32>
    %210 = vector.extract_strided_slice %199 {offsets = [0, 64], sizes = [8, 32], strides = [1, 1]} : vector<8x96xf32> to vector<8x32xf32>
    %211 = vector.extract_strided_slice %209 {offsets = [0, 0], sizes = [8, 32], strides = [1, 1]} : vector<8x64xf32> to vector<8x32xf32>
    %212 = vector.extract_strided_slice %201 {offsets = [0, 64], sizes = [8, 32], strides = [1, 1]} : vector<8x96xf32> to vector<8x32xf32>
    %213 = arith.mulf %211, %212 : vector<8x32xf32>
    %214 = arith.addf %210, %213 : vector<8x32xf32>
    %215 = math.tanh %214 : vector<8x32xf32>
    %216 = vector.extract_strided_slice %209 {offsets = [0, 32], sizes = [8, 32], strides = [1, 1]} : vector<8x64xf32> to vector<8x32xf32>
    %217 = arith.subf %175, %215 : vector<8x32xf32>
    %218 = arith.mulf %216, %217 : vector<8x32xf32>
    %219 = arith.addf %215, %218 : vector<8x32xf32>
    %cst_60 = arith.constant dense<0.000000e+00> : vector<8x96xf32>
    %220 = tpu.matmul %219, %1, %cst_60 {dimension_numbers = #tpu.dot_dimension_numbers<[1], [0], [0], [1], [0, 0, 1, 1], [], []>} : vector<8x32xf32>, vector<32x96xf32>, vector<8x96xf32> -> vector<8x96xf32>
    %221 = arith.addf %220, %6 : vector<8x96xf32>
    %cst_61 = arith.constant dense<0.000000e+00> : vector<8x96xf32>
    %222 = tpu.matmul %197, %3, %cst_61 {dimension_numbers = #tpu.dot_dimension_numbers<[1], [0], [0], [1], [0, 0, 1, 1], [], []>} : vector<8x32xf32>, vector<32x96xf32>, vector<8x96xf32> -> vector<8x96xf32>
    %223 = arith.addf %222, %12 : vector<8x96xf32>
    %224 = vector.extract_strided_slice %221 {offsets = [0, 0], sizes = [8, 64], strides = [1, 1]} : vector<8x96xf32> to vector<8x64xf32>
    %225 = vector.extract_strided_slice %223 {offsets = [0, 0], sizes = [8, 64], strides = [1, 1]} : vector<8x96xf32> to vector<8x64xf32>
    %226 = arith.addf %224, %225 : vector<8x64xf32>
    %227 = arith.negf %226 : vector<8x64xf32>
    %228 = math.exp %227 : vector<8x64xf32>
    %cst_62 = arith.constant 1.000000e+00 : f32
    %229 = vector.broadcast %cst_62 : f32 to vector<8x64xf32>
    %230 = arith.addf %229, %228 : vector<8x64xf32>
    %231 = arith.divf %229, %230 : vector<8x64xf32>
    %232 = vector.extract_strided_slice %221 {offsets = [0, 64], sizes = [8, 32], strides = [1, 1]} : vector<8x96xf32> to vector<8x32xf32>
    %233 = vector.extract_strided_slice %231 {offsets = [0, 0], sizes = [8, 32], strides = [1, 1]} : vector<8x64xf32> to vector<8x32xf32>
    %234 = vector.extract_strided_slice %223 {offsets = [0, 64], sizes = [8, 32], strides = [1, 1]} : vector<8x96xf32> to vector<8x32xf32>
    %235 = arith.mulf %233, %234 : vector<8x32xf32>
    %236 = arith.addf %232, %235 : vector<8x32xf32>
    %237 = math.tanh %236 : vector<8x32xf32>
    %238 = vector.extract_strided_slice %231 {offsets = [0, 32], sizes = [8, 32], strides = [1, 1]} : vector<8x64xf32> to vector<8x32xf32>
    %239 = arith.subf %197, %237 : vector<8x32xf32>
    %240 = arith.mulf %238, %239 : vector<8x32xf32>
    %241 = arith.addf %237, %240 : vector<8x32xf32>
    %c32_63 = arith.constant 32 : index
    %c0_64 = arith.constant 0 : index
    %242 = vector.load %arg10[%c32_63, %c0_64] : memref<64x32xf32, #tpu.memory_space<vmem>>, vector<8x32xf32>
    tpu.vector_store %arg10[%c32_63, %c0_64], %241 {strides = array<i32>} : memref<64x32xf32, #tpu.memory_space<vmem>>, vector<8x32xf32>,
    %c40 = arith.constant 40 : index
    %c0_65 = arith.constant 0 : index
    %243 = vector.load %arg11[%c40, %c0_65] : memref<64x96xf32, #tpu.memory_space<vmem>>, vector<8x96xf32>
    %cst_66 = arith.constant dense<0.000000e+00> : vector<8x96xf32>
    %244 = tpu.matmul %219, %2, %cst_66 {dimension_numbers = #tpu.dot_dimension_numbers<[1], [0], [0], [1], [0, 0, 1, 1], [], []>} : vector<8x32xf32>, vector<32x96xf32>, vector<8x96xf32> -> vector<8x96xf32>
    %245 = arith.addf %244, %9 : vector<8x96xf32>
    %246 = vector.extract_strided_slice %243 {offsets = [0, 0], sizes = [8, 64], strides = [1, 1]} : vector<8x96xf32> to vector<8x64xf32>
    %247 = vector.extract_strided_slice %245 {offsets = [0, 0], sizes = [8, 64], strides = [1, 1]} : vector<8x96xf32> to vector<8x64xf32>
    %248 = arith.addf %246, %247 : vector<8x64xf32>
    %249 = arith.negf %248 : vector<8x64xf32>
    %250 = math.exp %249 : vector<8x64xf32>
    %cst_67 = arith.constant 1.000000e+00 : f32
    %251 = vector.broadcast %cst_67 : f32 to vector<8x64xf32>
    %252 = arith.addf %251, %250 : vector<8x64xf32>
    %253 = arith.divf %251, %252 : vector<8x64xf32>
    %254 = vector.extract_strided_slice %243 {offsets = [0, 64], sizes = [8, 32], strides = [1, 1]} : vector<8x96xf32> to vector<8x32xf32>
    %255 = vector.extract_strided_slice %253 {offsets = [0, 0], sizes = [8, 32], strides = [1, 1]} : vector<8x64xf32> to vector<8x32xf32>
    %256 = vector.extract_strided_slice %245 {offsets = [0, 64], sizes = [8, 32], strides = [1, 1]} : vector<8x96xf32> to vector<8x32xf32>
    %257 = arith.mulf %255, %256 : vector<8x32xf32>
    %258 = arith.addf %254, %257 : vector<8x32xf32>
    %259 = math.tanh %258 : vector<8x32xf32>
    %260 = vector.extract_strided_slice %253 {offsets = [0, 32], sizes = [8, 32], strides = [1, 1]} : vector<8x64xf32> to vector<8x32xf32>
    %261 = arith.subf %219, %259 : vector<8x32xf32>
    %262 = arith.mulf %260, %261 : vector<8x32xf32>
    %263 = arith.addf %259, %262 : vector<8x32xf32>
    %cst_68 = arith.constant dense<0.000000e+00> : vector<8x96xf32>
    %264 = tpu.matmul %263, %1, %cst_68 {dimension_numbers = #tpu.dot_dimension_numbers<[1], [0], [0], [1], [0, 0, 1, 1], [], []>} : vector<8x32xf32>, vector<32x96xf32>, vector<8x96xf32> -> vector<8x96xf32>
    %265 = arith.addf %264, %6 : vector<8x96xf32>
    %cst_69 = arith.constant dense<0.000000e+00> : vector<8x96xf32>
    %266 = tpu.matmul %241, %3, %cst_69 {dimension_numbers = #tpu.dot_dimension_numbers<[1], [0], [0], [1], [0, 0, 1, 1], [], []>} : vector<8x32xf32>, vector<32x96xf32>, vector<8x96xf32> -> vector<8x96xf32>
    %267 = arith.addf %266, %12 : vector<8x96xf32>
    %268 = vector.extract_strided_slice %265 {offsets = [0, 0], sizes = [8, 64], strides = [1, 1]} : vector<8x96xf32> to vector<8x64xf32>
    %269 = vector.extract_strided_slice %267 {offsets = [0, 0], sizes = [8, 64], strides = [1, 1]} : vector<8x96xf32> to vector<8x64xf32>
    %270 = arith.addf %268, %269 : vector<8x64xf32>
    %271 = arith.negf %270 : vector<8x64xf32>
    %272 = math.exp %271 : vector<8x64xf32>
    %cst_70 = arith.constant 1.000000e+00 : f32
    %273 = vector.broadcast %cst_70 : f32 to vector<8x64xf32>
    %274 = arith.addf %273, %272 : vector<8x64xf32>
    %275 = arith.divf %273, %274 : vector<8x64xf32>
    %276 = vector.extract_strided_slice %265 {offsets = [0, 64], sizes = [8, 32], strides = [1, 1]} : vector<8x96xf32> to vector<8x32xf32>
    %277 = vector.extract_strided_slice %275 {offsets = [0, 0], sizes = [8, 32], strides = [1, 1]} : vector<8x64xf32> to vector<8x32xf32>
    %278 = vector.extract_strided_slice %267 {offsets = [0, 64], sizes = [8, 32], strides = [1, 1]} : vector<8x96xf32> to vector<8x32xf32>
    %279 = arith.mulf %277, %278 : vector<8x32xf32>
    %280 = arith.addf %276, %279 : vector<8x32xf32>
    %281 = math.tanh %280 : vector<8x32xf32>
    %282 = vector.extract_strided_slice %275 {offsets = [0, 32], sizes = [8, 32], strides = [1, 1]} : vector<8x64xf32> to vector<8x32xf32>
    %283 = arith.subf %241, %281 : vector<8x32xf32>
    %284 = arith.mulf %282, %283 : vector<8x32xf32>
    %285 = arith.addf %281, %284 : vector<8x32xf32>
    %c40_71 = arith.constant 40 : index
    %c0_72 = arith.constant 0 : index
    %286 = vector.load %arg10[%c40_71, %c0_72] : memref<64x32xf32, #tpu.memory_space<vmem>>, vector<8x32xf32>
    tpu.vector_store %arg10[%c40_71, %c0_72], %285 {strides = array<i32>} : memref<64x32xf32, #tpu.memory_space<vmem>>, vector<8x32xf32>,
    %c48 = arith.constant 48 : index
    %c0_73 = arith.constant 0 : index
    %287 = vector.load %arg11[%c48, %c0_73] : memref<64x96xf32, #tpu.memory_space<vmem>>, vector<8x96xf32>
    %cst_74 = arith.constant dense<0.000000e+00> : vector<8x96xf32>
    %288 = tpu.matmul %263, %2, %cst_74 {dimension_numbers = #tpu.dot_dimension_numbers<[1], [0], [0], [1], [0, 0, 1, 1], [], []>} : vector<8x32xf32>, vector<32x96xf32>, vector<8x96xf32> -> vector<8x96xf32>
    %289 = arith.addf %288, %9 : vector<8x96xf32>
    %290 = vector.extract_strided_slice %287 {offsets = [0, 0], sizes = [8, 64], strides = [1, 1]} : vector<8x96xf32> to vector<8x64xf32>
    %291 = vector.extract_strided_slice %289 {offsets = [0, 0], sizes = [8, 64], strides = [1, 1]} : vector<8x96xf32> to vector<8x64xf32>
    %292 = arith.addf %290, %291 : vector<8x64xf32>
    %293 = arith.negf %292 : vector<8x64xf32>
    %294 = math.exp %293 : vector<8x64xf32>
    %cst_75 = arith.constant 1.000000e+00 : f32
    %295 = vector.broadcast %cst_75 : f32 to vector<8x64xf32>
    %296 = arith.addf %295, %294 : vector<8x64xf32>
    %297 = arith.divf %295, %296 : vector<8x64xf32>
    %298 = vector.extract_strided_slice %287 {offsets = [0, 64], sizes = [8, 32], strides = [1, 1]} : vector<8x96xf32> to vector<8x32xf32>
    %299 = vector.extract_strided_slice %297 {offsets = [0, 0], sizes = [8, 32], strides = [1, 1]} : vector<8x64xf32> to vector<8x32xf32>
    %300 = vector.extract_strided_slice %289 {offsets = [0, 64], sizes = [8, 32], strides = [1, 1]} : vector<8x96xf32> to vector<8x32xf32>
    %301 = arith.mulf %299, %300 : vector<8x32xf32>
    %302 = arith.addf %298, %301 : vector<8x32xf32>
    %303 = math.tanh %302 : vector<8x32xf32>
    %304 = vector.extract_strided_slice %297 {offsets = [0, 32], sizes = [8, 32], strides = [1, 1]} : vector<8x64xf32> to vector<8x32xf32>
    %305 = arith.subf %263, %303 : vector<8x32xf32>
    %306 = arith.mulf %304, %305 : vector<8x32xf32>
    %307 = arith.addf %303, %306 : vector<8x32xf32>
    %cst_76 = arith.constant dense<0.000000e+00> : vector<8x96xf32>
    %308 = tpu.matmul %307, %1, %cst_76 {dimension_numbers = #tpu.dot_dimension_numbers<[1], [0], [0], [1], [0, 0, 1, 1], [], []>} : vector<8x32xf32>, vector<32x96xf32>, vector<8x96xf32> -> vector<8x96xf32>
    %309 = arith.addf %308, %6 : vector<8x96xf32>
    %cst_77 = arith.constant dense<0.000000e+00> : vector<8x96xf32>
    %310 = tpu.matmul %285, %3, %cst_77 {dimension_numbers = #tpu.dot_dimension_numbers<[1], [0], [0], [1], [0, 0, 1, 1], [], []>} : vector<8x32xf32>, vector<32x96xf32>, vector<8x96xf32> -> vector<8x96xf32>
    %311 = arith.addf %310, %12 : vector<8x96xf32>
    %312 = vector.extract_strided_slice %309 {offsets = [0, 0], sizes = [8, 64], strides = [1, 1]} : vector<8x96xf32> to vector<8x64xf32>
    %313 = vector.extract_strided_slice %311 {offsets = [0, 0], sizes = [8, 64], strides = [1, 1]} : vector<8x96xf32> to vector<8x64xf32>
    %314 = arith.addf %312, %313 : vector<8x64xf32>
    %315 = arith.negf %314 : vector<8x64xf32>
    %316 = math.exp %315 : vector<8x64xf32>
    %cst_78 = arith.constant 1.000000e+00 : f32
    %317 = vector.broadcast %cst_78 : f32 to vector<8x64xf32>
    %318 = arith.addf %317, %316 : vector<8x64xf32>
    %319 = arith.divf %317, %318 : vector<8x64xf32>
    %320 = vector.extract_strided_slice %309 {offsets = [0, 64], sizes = [8, 32], strides = [1, 1]} : vector<8x96xf32> to vector<8x32xf32>
    %321 = vector.extract_strided_slice %319 {offsets = [0, 0], sizes = [8, 32], strides = [1, 1]} : vector<8x64xf32> to vector<8x32xf32>
    %322 = vector.extract_strided_slice %311 {offsets = [0, 64], sizes = [8, 32], strides = [1, 1]} : vector<8x96xf32> to vector<8x32xf32>
    %323 = arith.mulf %321, %322 : vector<8x32xf32>
    %324 = arith.addf %320, %323 : vector<8x32xf32>
    %325 = math.tanh %324 : vector<8x32xf32>
    %326 = vector.extract_strided_slice %319 {offsets = [0, 32], sizes = [8, 32], strides = [1, 1]} : vector<8x64xf32> to vector<8x32xf32>
    %327 = arith.subf %285, %325 : vector<8x32xf32>
    %328 = arith.mulf %326, %327 : vector<8x32xf32>
    %329 = arith.addf %325, %328 : vector<8x32xf32>
    %c48_79 = arith.constant 48 : index
    %c0_80 = arith.constant 0 : index
    %330 = vector.load %arg10[%c48_79, %c0_80] : memref<64x32xf32, #tpu.memory_space<vmem>>, vector<8x32xf32>
    tpu.vector_store %arg10[%c48_79, %c0_80], %329 {strides = array<i32>} : memref<64x32xf32, #tpu.memory_space<vmem>>, vector<8x32xf32>,
    %c56 = arith.constant 56 : index
    %c0_81 = arith.constant 0 : index
    %331 = vector.load %arg11[%c56, %c0_81] : memref<64x96xf32, #tpu.memory_space<vmem>>, vector<8x96xf32>
    %cst_82 = arith.constant dense<0.000000e+00> : vector<8x96xf32>
    %332 = tpu.matmul %307, %2, %cst_82 {dimension_numbers = #tpu.dot_dimension_numbers<[1], [0], [0], [1], [0, 0, 1, 1], [], []>} : vector<8x32xf32>, vector<32x96xf32>, vector<8x96xf32> -> vector<8x96xf32>
    %333 = arith.addf %332, %9 : vector<8x96xf32>
    %334 = vector.extract_strided_slice %331 {offsets = [0, 0], sizes = [8, 64], strides = [1, 1]} : vector<8x96xf32> to vector<8x64xf32>
    %335 = vector.extract_strided_slice %333 {offsets = [0, 0], sizes = [8, 64], strides = [1, 1]} : vector<8x96xf32> to vector<8x64xf32>
    %336 = arith.addf %334, %335 : vector<8x64xf32>
    %337 = arith.negf %336 : vector<8x64xf32>
    %338 = math.exp %337 : vector<8x64xf32>
    %cst_83 = arith.constant 1.000000e+00 : f32
    %339 = vector.broadcast %cst_83 : f32 to vector<8x64xf32>
    %340 = arith.addf %339, %338 : vector<8x64xf32>
    %341 = arith.divf %339, %340 : vector<8x64xf32>
    %342 = vector.extract_strided_slice %331 {offsets = [0, 64], sizes = [8, 32], strides = [1, 1]} : vector<8x96xf32> to vector<8x32xf32>
    %343 = vector.extract_strided_slice %341 {offsets = [0, 0], sizes = [8, 32], strides = [1, 1]} : vector<8x64xf32> to vector<8x32xf32>
    %344 = vector.extract_strided_slice %333 {offsets = [0, 64], sizes = [8, 32], strides = [1, 1]} : vector<8x96xf32> to vector<8x32xf32>
    %345 = arith.mulf %343, %344 : vector<8x32xf32>
    %346 = arith.addf %342, %345 : vector<8x32xf32>
    %347 = math.tanh %346 : vector<8x32xf32>
    %348 = vector.extract_strided_slice %341 {offsets = [0, 32], sizes = [8, 32], strides = [1, 1]} : vector<8x64xf32> to vector<8x32xf32>
    %349 = arith.subf %307, %347 : vector<8x32xf32>
    %350 = arith.mulf %348, %349 : vector<8x32xf32>
    %351 = arith.addf %347, %350 : vector<8x32xf32>
    %cst_84 = arith.constant dense<0.000000e+00> : vector<8x96xf32>
    %352 = tpu.matmul %351, %1, %cst_84 {dimension_numbers = #tpu.dot_dimension_numbers<[1], [0], [0], [1], [0, 0, 1, 1], [], []>} : vector<8x32xf32>, vector<32x96xf32>, vector<8x96xf32> -> vector<8x96xf32>
    %353 = arith.addf %352, %6 : vector<8x96xf32>
    %cst_85 = arith.constant dense<0.000000e+00> : vector<8x96xf32>
    %354 = tpu.matmul %329, %3, %cst_85 {dimension_numbers = #tpu.dot_dimension_numbers<[1], [0], [0], [1], [0, 0, 1, 1], [], []>} : vector<8x32xf32>, vector<32x96xf32>, vector<8x96xf32> -> vector<8x96xf32>
    %355 = arith.addf %354, %12 : vector<8x96xf32>
    %356 = vector.extract_strided_slice %353 {offsets = [0, 0], sizes = [8, 64], strides = [1, 1]} : vector<8x96xf32> to vector<8x64xf32>
    %357 = vector.extract_strided_slice %355 {offsets = [0, 0], sizes = [8, 64], strides = [1, 1]} : vector<8x96xf32> to vector<8x64xf32>
    %358 = arith.addf %356, %357 : vector<8x64xf32>
    %359 = arith.negf %358 : vector<8x64xf32>
    %360 = math.exp %359 : vector<8x64xf32>
    %cst_86 = arith.constant 1.000000e+00 : f32
    %361 = vector.broadcast %cst_86 : f32 to vector<8x64xf32>
    %362 = arith.addf %361, %360 : vector<8x64xf32>
    %363 = arith.divf %361, %362 : vector<8x64xf32>
    %364 = vector.extract_strided_slice %353 {offsets = [0, 64], sizes = [8, 32], strides = [1, 1]} : vector<8x96xf32> to vector<8x32xf32>
    %365 = vector.extract_strided_slice %363 {offsets = [0, 0], sizes = [8, 32], strides = [1, 1]} : vector<8x64xf32> to vector<8x32xf32>
    %366 = vector.extract_strided_slice %355 {offsets = [0, 64], sizes = [8, 32], strides = [1, 1]} : vector<8x96xf32> to vector<8x32xf32>
    %367 = arith.mulf %365, %366 : vector<8x32xf32>
    %368 = arith.addf %364, %367 : vector<8x32xf32>
    %369 = math.tanh %368 : vector<8x32xf32>
    %370 = vector.extract_strided_slice %363 {offsets = [0, 32], sizes = [8, 32], strides = [1, 1]} : vector<8x64xf32> to vector<8x32xf32>
    %371 = arith.subf %329, %369 : vector<8x32xf32>
    %372 = arith.mulf %370, %371 : vector<8x32xf32>
    %373 = arith.addf %369, %372 : vector<8x32xf32>
    %c56_87 = arith.constant 56 : index
    %c0_88 = arith.constant 0 : index
    %374 = vector.load %arg10[%c56_87, %c0_88] : memref<64x32xf32, #tpu.memory_space<vmem>>, vector<8x32xf32>
    tpu.vector_store %arg10[%c56_87, %c0_88], %373 {strides = array<i32>} : memref<64x32xf32, #tpu.memory_space<vmem>>, vector<8x32xf32>,
    return
  }
}

</mosaic_0001>

<bundles_post_ra>
// kernel: grunn_pallas.1
= control target key start
LH: loop header
LB: loop body
LE: loop exit
PB: predicated region body
PF: predicated region fallthrough
CT: control target
= control target key end

     0   :  { %vm109_vm0 = vcmask 1041408   ;;  %vm84_vm1 = vcmask 15360   ;;  %v3072_v0 = vmov 0.0   ;;  %vm3073_vm2 = vmmov 0   ;;  %s3075_s12 = smov 32   ;;  %s3076_s24 = smov 96   ;;  %s3786_s2 = inlined_call_operand.vmem [shape: f32[2,96], index: 2, kind: input, shape index: {}]   ;;  %s3787_s3 = inlined_call_operand.vmem [shape: f32[32,96], index: 3, kind: input, shape index: {}]   ;;  %s3788_s0 = inlined_call_operand.vmem [shape: f32[64,2], index: 0, kind: input, shape index: {}]   ;;  %s3789_s1 = inlined_call_operand.vmem [shape: f32[2,8,32], index: 1, kind: input, shape index: {}]   ;;  %s3790_s4 = inlined_call_operand.vmem [shape: f32[1,96], index: 4, kind: input, shape index: {}]   ;;  %s3791_s5 = inlined_call_operand.vmem [shape: f32[1,96], index: 5, kind: input, shape index: {}]   ;;  %s3792_s7 = inlined_call_operand.vmem [shape: f32[32,96], index: 7, kind: input, shape index: {}]   ;;  %s3793_s6 = inlined_call_operand.vmem [shape: f32[32,96], index: 6, kind: input, shape index: {}]   ;;  %s3794_s9 = inlined_call_operand.vmem [shape: f32[1,96], index: 9, kind: input, shape index: {}]   ;;  %s3795_s8 = inlined_call_operand.vmem [shape: f32[1,96], index: 8, kind: input, shape index: {}]   ;;  %s3796_s10 = inlined_call_operand.vmem [shape: f32[64,32], index: 10, kind: output, shape index: {}]  }
   0x1   :  { %2692 = vmatprep.subr.mxu1 %v3072_v0  ;;  %v35_v1 = vld [vmem:[%s3786_s2] sm:$0x3]  ;;  %v3139_v2 = vld [vmem:[%s3787_s3 + $0x18] sm:$0xff]  ;;  %2700 = vmatprep.mubr.msk.f32.mxu1 %vm3073_vm2, %v3072_v0  ;;  %v70_v4 = vld [vmem:[%s3788_s0 + $0x8] sm:$0xff]  ;;  %vm231_vm3 = vcmask 261120   ;;  %vm218_vm4 = vcmask 785408  }
   0x2   :  { %v69_v3 = vld [vmem:[%s3788_s0] sm:$0xff]  ;;  %2678 = vmatprep.subr.msk.mxu0 %vm109_vm0, %v35_v1  ;;  %2693 = vmatpush3.msra.mxu1 %v3139_v2  ;;  %v3153_v5 = vld [vmem:[%s3787_s3 + $0x10] sm:$0xff]  ;;  %v3161_v6 = vld [vmem:[%s3787_s3 + $0x8] sm:$0xff] }
   0x3   :  { %2679 = vmatpush3.msk.msra.mxu0 %vm109_vm0, %v35_v1  ;;  %2680 = vmatprep.mubr.msk.f32.mxu0 %vm84_vm1, %v69_v3  ;;  %v3169_v7 = vld [vmem:[%s3787_s3] sm:$0xff]  ;;  %v71_v31 = vld [vmem:[%s3788_s0 + $0x10] sm:$0xff]  ;;  %v72_v32 = vld [vmem:[%s3788_s0 + $0x18] sm:$0xff] }
   0x4   :  { %2694 = vmatprep.subr.mxu1 %v3072_v0  ;;  %2681 = vmatmul.mubr.msk.f32.vlgmr.msra.gmra.mxu0 %vm84_vm1, %v70_v4  ;;  %v227_v8 = vld [vmem:[%s3789_s1] sm:$0xff]  ;;  %v3209_v33 = vld [vmem:[%s3792_s7 + $0x18] sm:$0xff]  ;;  %v3215_v34 = vld [vmem:[%s3792_s7 + $0x10] sm:$0xff] }
   0x5   :  { %2695 = vmatpush3.msra.mxu1 %v3153_v5  ;;  %2714 = vmatprep.subr.mxu0 %v3072_v0  ;;  %v3184_v10 = vld [vmem:[%s3790_s4] ss:$0 sm:$0xff]  ;;  %s3074_s4 = smov 64   ;;  %v3226_v36 = vld [vmem:[%s3792_s7 + $0x8] sm:$0xff]  ;;  %v3231_v37 = vld [vmem:[%s3793_s6 + $0x18] sm:$0xff] }
   0x6   :  { %2696 = vmatprep.subr.mxu1 %v3072_v0  ;;  %v3192_v14 = vld [vmem:[%s3791_s5] ss:$0 sm:$0xff]  ;;  %2683 = vmatprep.mubr.msk.f32.mxu0 %vm84_vm1, %v71_v31  ;;  %v74_v38 = vld [vmem:[%s3788_s0 + $0x28] sm:$0xff]  ;;  %v75_v39 = vld [vmem:[%s3788_s0 + $0x30] sm:$0xff] }
   0x7   :  { %2697 = vmatpush3.msra.mxu1 %v3161_v6  ;;  %v73_v35 = vld [vmem:[%s3788_s0 + $0x20] sm:$0xff]  ;;  %2715 = vmatpush3.msra.mxu0 %v3209_v33  ;;  %v3253_v41 = vld [vmem:[%s3793_s6 + $0x10] sm:$0xff]  ;;  %v76_v43 = vld [vmem:[%s3788_s0 + $0x38] sm:$0xff] }
   0x8   :  { %2698 = vmatprep.subr.mxu1 %v3072_v0  ;;  %2684 = vmatmul.mubr.msk.f32.gmra.mxu0 %vm84_vm1, %v72_v32  ;;  %v3245_v40 = vld [vmem:[%s3792_s7] sm:$0xff]  ;;  %v3266_v45 = vld [vmem:[%s3793_s6 + $0x8] sm:$0xff] }
   0x9   :  { %2699 = vmatpush3.msra.mxu1 %v3169_v7  ;;  %2716 = vmatprep.subr.mxu0 %v3072_v0  ;;  %v3275_v46 = vld [vmem:[%s3793_s6] sm:$0xff]  ;;  %v3280_v47 = vld [vmem:[%s3789_s1 + $0x8] sm:$0xff] }
   0xa   :  { %2701 = vmatmul.mubr.msk.f32.vlgmr.msra.gmra.mxu1 %vm231_vm3, %v227_v8  ;;  %2703 = vmatprep.subr.mxu1 %v3072_v0  ;;  %v3316_v61 = vld [vmem:[%s3794_s9] ss:$0 sm:$0xff] }
   0xb   :  { %2711 = vmatprep.mubr.msk.f32.mxu1 %vm3073_vm2, %v3072_v0  ;;  %2717 = vmatpush3.msra.mxu0 %v3215_v34 }
   0xc   :  { %2686 = vmatprep.mubr.msk.f32.mxu0 %vm84_vm1, %v73_v35  ;;  %2718 = vmatprep.subr.mxu0 %v3072_v0 }
   0xd   :  { %2704 = vmatpush3.msra.mxu1 %v3231_v37  ;;  %2719 = vmatpush3.msra.mxu0 %v3226_v36 }
   0xe   :  { %2705 = vmatprep.subr.mxu1 %v3072_v0  ;;  %2687 = vmatmul.mubr.msk.f32.gmra.mxu0 %vm84_vm1, %v74_v38 }
   0xf   :  { %2720 = vmatprep.subr.mxu0 %v3072_v0  ;;  %2689 = vmatprep.mubr.msk.f32.mxu0 %vm84_vm1, %v75_v39 }
  0x10   :  { %2721 = vmatpush3.msra.mxu0 %v3245_v40  ;;  %2706 = vmatpush3.msra.mxu1 %v3253_v41 }
  0x11   :  { %2736 = vmatprep.subr.mxu0 %v3072_v0  ;;  %2707 = vmatprep.subr.mxu1 %v3072_v0 }
  0x12   :  { %2690 = vmatmul.mubr.msk.f32.gmra.mxu0 %vm84_vm1, %v76_v43  ;;  %2708 = vmatpush3.msra.mxu1 %v3266_v45 }
  0x13   :  { %2722 = vmatprep.mubr.msk.f32.mxu0 %vm3073_vm2, %v3072_v0  ;;  %2709 = vmatprep.subr.mxu1 %v3072_v0 }
  0x14   :  { %2710 = vmatpush3.msra.mxu1 %v3275_v46 }
  0x15   :  { %2725 = vmatprep.subr.mxu1 %v3072_v0 }
  0x16   :  { %2723 = vmatmul.mubr.msk.f32.vlgmr.msra.gmra.mxu0 %vm231_vm3, %v3280_v47 }
  0x17   :  { %2737 = vmatpush3.msra.mxu0 %v3231_v37  ;;  %2744 = vmatprep.mubr.msk.f32.mxu0 %vm3073_vm2, %v3072_v0 }
  0x18   :  { %2738 = vmatprep.subr.mxu0 %v3072_v0 }
  0x19   :  { %2739 = vmatpush3.msra.mxu0 %v3253_v41 }
  0x1a   :  { %2740 = vmatprep.subr.mxu0 %v3072_v0 }
  0x1b   :  { %2741 = vmatpush3.msra.mxu0 %v3266_v45 }
  0x1c   :  { %2742 = vmatprep.subr.mxu0 %v3072_v0 }
  0x1d   :  { %2743 = vmatpush3.msra.mxu0 %v3275_v46 }
  0x1e   :  { %2758 = vmatprep.subr.mxu0 %v3072_v0 }
  0xc4   :  { %v2682_v9 = vpop.f32.mrf.mxu0 }
  0xc5   :  { %v185_v11 = vadd.f32 %v2682_v9, %v3184_v10 }
  0xc6   :  { %v179_v12 = vpop.f32.mrf.mxu0 }
  0xc7   :  { %220 = vst.msk [vmem:[#allocation2 + $0x8] sm:$0xff] %vm218_vm4, %v185_v11  ;;  %v180_v13 = vadd.f32 %v3184_v10, %v179_v12 }
  0xc8   :  { %v2685_v50 = vpop.f32.mrf.mxu0 }
  0xc9   :  { %219 = vst.msk [vmem:[#allocation2] sm:$0xff] %vm218_vm4, %v180_v13  ;;  %v195_v51 = vadd.f32 %v2685_v50, %v3184_v10 }
  0xca   :  { %v301_v15 = vpop.f32.mrf.mxu1  ;;  %v189_v52 = vpop.f32.mrf.mxu0 }
  0xcb   :  { %v302_v16 = vadd.f32 %v3192_v14, %v301_v15  ;;  %222 = vst.msk [vmem:[#allocation2 + $0x18] sm:$0xff] %vm218_vm4, %v195_v51  ;;  %v190_v53 = vadd.f32 %v3184_v10, %v189_v52 }
  0xcc   :  { %v2702_v17 = vpop.f32.mrf.mxu1 }
  0xcd   :  { %313 = vrot.lane.b32.xlu0 %v302_v16, %s3074_s4  ;;  %221 = vst.msk [vmem:[#allocation2 + $0x10] sm:$0xff] %vm218_vm4, %v190_v53 }
  0xce   :  { %v2688_v54 = vpop.f32.mrf.mxu0 }
  0xcf   :  { %v205_v55 = vadd.f32 %v2688_v54, %v3184_v10 }
  0xd0   :  { %v230_v18 = vld [vmem:[#allocation2] sm:$0xff]  ;;  %v199_v56 = vpop.f32.mrf.mxu0 }
  0xd1   :  { %v305_v19 = vadd.f32 %v302_v16, %v230_v18  ;;  %224 = vst.msk [vmem:[#allocation2 + $0x28] sm:$0xff] %vm218_vm4, %v205_v55  ;;  %v200_v57 = vadd.f32 %v3184_v10, %v199_v56 }
  0xd2   :  { %v2691_v58 = vpop.f32.mrf.mxu0 }
  0xd3   :  { %v2510_v20 = vmul.f32 -1.442695, %v305_v19  ;;  %223 = vst.msk [vmem:[#allocation2 + $0x20] sm:$0xff] %vm218_vm4, %v200_v57  ;;  %v215_v59 = vadd.f32 %v2691_v58, %v3184_v10 }
  0xd4   :  { %v209_v60 = vpop.f32.mrf.mxu0 }
  0xd5   :  { %2961 = vpow2.f32 %v2510_v20  ;;  %226 = vst.msk [vmem:[#allocation2 + $0x38] sm:$0xff] %vm218_vm4, %v215_v59  ;;  %v210_v62 = vadd.f32 %v3184_v10, %v209_v60 }
  0xd6   :  { %v482_v63 = vpop.f32.mrf.mxu0 }
  0xd7   :  { %225 = vst.msk [vmem:[#allocation2 + $0x30] sm:$0xff] %vm218_vm4, %v210_v62  ;;  %v483_v1 = vadd.f32 %v3316_v61, %v482_v63 }
  0xd8   :  { %v2724_v3 = vpop.f32.mrf.mxu0 }
  0xe2   :  { %v2962_v21 = vpop.eup %2961 }
  0xe3   :  { %v309_v22 = vadd.f32 1.0, %v2962_v21 }
  0xe5   :  { %2963 = vrcp.f32 %v309_v22 }
  0xf2   :  { %v2964_v23 = vpop.eup %2963 }
 0x13f   :  { %v314_v24 = vpop.permute.xlu0 %313 }
 0x140   :  { %v316_v25 = vmul.f32 %v2964_v23, %v314_v24 }
 0x142   :  { %318 = vrot.lane.b32.xlu0 %v316_v25, %s3074_s4 }
 0x1b4   :  { %v319_v26 = vpop.permute.xlu0 %318 }
 0x1b5   :  { %v321_v27 = vadd.f32 %v319_v26, %v230_v18 }
 0x1b7   :  { %2965 = vtanh.f32 %v321_v27 }
 0x1c4   :  { %v2966_v28 = vpop.eup %2965 }
 0x1c5   :  { %324 = vrot.lane.b32.xlu1 %v2966_v28, %s3074_s4 }
 0x237   :  { %v325_v29 = vpop.permute.xlu1 %324 }
 0x238   :  { %v327_v30 = vsub.f32 %v227_v8, %v325_v29  ;;  %v3348_v8 = vld [vmem:[%s3795_s8] ss:$0 sm:$0xff] }
 0x23a   :  { %329 = vrot.lane.b32.xlu1 %v327_v30, %s3075_s12 }
 0x2ac   :  { %v330_v42 = vpop.permute.xlu1 %329 }
 0x2ad   :  { %v332_v44 = vmul.f32 %v2964_v23, %v330_v42  ;;  %v524_v23 = vld [vmem:[#allocation2 + $0x8] sm:$0xff] }
 0x2af   :  { %334 = vrot.lane.b32.xlu0 %v332_v44, %s3075_s12 }
 0x2b3   :  { %494 = vrot.lane.b32.xlu0 %v483_v1, %s3074_s4 }
 0x321   :  { %v335_v48 = vpop.permute.xlu0 %334 }
 0x322   :  { %v3300_v49 = vadd.f32 %v2966_v28, %v335_v48 }
 0x324   :  { %339 = vrot.lane.b32.xlu1 %v3300_v49, %s3074_s4 }
 0x325   :  { %v495_v20 = vpop.permute.xlu0 %494 }
 0x396   :  { %v340_v4 = vpop.permute.xlu1 %339 }
 0x397   :  { %2712 = vmatmul.mubr.msk.f32.vlgmr.msra.gmra.mxu1 %vm231_vm3, %v340_v4 }
 0x398   :  { %2726 = vmatpush3.msra.mxu1 %v3139_v2  ;;  %2733 = vmatprep.mubr.msk.f32.mxu1 %vm3073_vm2, %v3072_v0 }
 0x399   :  { %2727 = vmatprep.subr.mxu1 %v3072_v0 }
 0x39a   :  { %2728 = vmatpush3.msra.mxu1 %v3153_v5 }
 0x39b   :  { %2729 = vmatprep.subr.mxu1 %v3072_v0 }
 0x39c   :  { %2730 = vmatpush3.msra.mxu1 %v3161_v6 }
 0x39d   :  { %2731 = vmatprep.subr.mxu1 %v3072_v0 }
 0x39e   :  { %2732 = vmatpush3.msra.mxu1 %v3169_v7 }
 0x39f   :  { %2734 = vmatmul.mubr.msk.f32.vlgmr.msra.gmra.mxu1 %vm231_vm3, %v340_v4  ;;  %2747 = vmatprep.subr.mxu1 %v3072_v0 }
 0x3a0   :  { %2748 = vmatpush3.msra.mxu1 %v3209_v33  ;;  %2755 = vmatprep.mubr.msk.f32.mxu1 %vm3073_vm2, %v3072_v0 }
 0x3a1   :  { %2749 = vmatprep.subr.mxu1 %v3072_v0 }
 0x3a2   :  { %2750 = vmatpush3.msra.mxu1 %v3215_v34 }
 0x3a3   :  { %2751 = vmatprep.subr.mxu1 %v3072_v0 }
 0x3a4   :  { %2752 = vmatpush3.msra.mxu1 %v3226_v36 }
 0x3a5   :  { %2753 = vmatprep.subr.mxu1 %v3072_v0 }
 0x3a6   :  { %2754 = vmatpush3.msra.mxu1 %v3245_v40 }
 0x3a7   :  { %2769 = vmatprep.subr.mxu1 %v3072_v0 }
 0x457   :  { %v409_v9 = vpop.f32.mrf.mxu1 }
 0x458   :  { %v410_v10 = vadd.f32 %v3348_v8, %v409_v9  ;;  %v805_v9 = vld [vmem:[#allocation2 + $0x10] sm:$0xff] }
 0x459   :  { %v2713_v11 = vpop.f32.mrf.mxu1 }
 0x45a   :  { %v486_v12 = vadd.f32 %v483_v1, %v410_v10 }
 0x45c   :  { %v2513_v13 = vmul.f32 -1.442695, %v486_v12 }
 0x45e   :  { %2967 = vpow2.f32 %v2513_v13 }
 0x45f   :  { %v591_v15 = vpop.f32.mrf.mxu1 }
 0x460   :  { %v592_v16 = vadd.f32 %v3192_v14, %v591_v15 }
 0x461   :  { %v2735_v17 = vpop.f32.mrf.mxu1 }
 0x462   :  { %603 = vrot.lane.b32.xlu1 %v592_v16, %s3074_s4  ;;  %v595_v24 = vadd.f32 %v592_v16, %v524_v23 }
 0x464   :  { %v2515_v25 = vmul.f32 -1.442695, %v595_v24 }
 0x46b   :  { %v2968_v18 = vpop.eup %2967 }
 0x46c   :  { %v490_v19 = vadd.f32 1.0, %v2968_v18 }
 0x46e   :  { %2969 = vrcp.f32 %v490_v19 }
 0x46f   :  { %2971 = vpow2.f32 %v2515_v25 }
 0x47b   :  { %v2970_v21 = vpop.eup %2969 }
 0x47c   :  { %v497_v22 = vmul.f32 %v2970_v21, %v495_v20  ;;  %v2972_v26 = vpop.eup %2971 }
 0x47d   :  { %v599_v27 = vadd.f32 1.0, %v2972_v26 }
 0x47e   :  { %499 = vrot.lane.b32.xlu0 %v497_v22, %s3074_s4 }
 0x47f   :  { %2973 = vrcp.f32 %v599_v27 }
 0x48c   :  { %v2974_v28 = vpop.eup %2973 }
 0x4d4   :  { %v604_v29 = vpop.permute.xlu1 %603 }
 0x4d5   :  { %v606_v30 = vmul.f32 %v2974_v28, %v604_v29 }
 0x4d7   :  { %608 = vrot.lane.b32.xlu1 %v606_v30, %s3074_s4 }
 0x4f0   :  { %v500_v31 = vpop.permute.xlu0 %499 }
 0x4f1   :  { %v502_v32 = vadd.f32 %v500_v31, %v410_v10 }
 0x4f3   :  { %2975 = vtanh.f32 %v502_v32 }
 0x500   :  { %v2976_v35 = vpop.eup %2975 }
 0x501   :  { %505 = vrot.lane.b32.xlu0 %v2976_v35, %s3074_s4 }
 0x549   :  { %v609_v38 = vpop.permute.xlu1 %608 }
 0x54a   :  { %v611_v39 = vadd.f32 %v609_v38, %v524_v23 }
 0x54c   :  { %2977 = vtanh.f32 %v611_v39 }
 0x559   :  { %v2978_v42 = vpop.eup %2977 }
 0x55a   :  { %v613_v43 = vsub.f32 %v3300_v49, %v2978_v42 }
 0x55c   :  { %615 = vrot.lane.b32.xlu1 %v613_v43, %s3076_s24 }
 0x573   :  { %v506_v44 = vpop.permute.xlu0 %505 }
 0x574   :  { %v508_v48 = vsub.f32 %v3280_v47, %v506_v44 }
 0x576   :  { %510 = vrot.lane.b32.xlu0 %v508_v48, %s3075_s12 }
 0x5ce   :  { %v616_v50 = vpop.permute.xlu1 %615 }
 0x5cf   :  { %v618_v51 = vmul.f32 %v2974_v28, %v616_v50 }
 0x5d1   :  { %620 = vrot.lane.b32.xlu1 %v618_v51, %s3075_s12 }
 0x5e8   :  { %v511_v52 = vpop.permute.xlu0 %510 }
 0x5e9   :  { %v513_v53 = vmul.f32 %v2970_v21, %v511_v52 }
 0x5eb   :  { %515 = vrot.lane.b32.xlu0 %v513_v53, %s3075_s12 }
 0x643   :  { %v621_v54 = vpop.permute.xlu1 %620 }
 0x644   :  { %v3362_v55 = vadd.f32 %v2978_v42, %v621_v54 }
 0x646   :  { %625 = vrot.lane.b32.xlu1 %v3362_v55, %s3074_s4 }
 0x65d   :  { %v516_v49 = vpop.permute.xlu0 %515 }
 0x65e   :  { %v3366_v56 = vadd.f32 %v2976_v35, %v516_v49 }
 0x660   :  { %520 = vrot.lane.b32.xlu0 %v3366_v56, %s3074_s4 }
 0x6b8   :  { %v626_v47 = vpop.permute.xlu1 %625 }
 0x6b9   :  { %2745 = vmatmul.mubr.msk.f32.vlgmr.msra.gmra.mxu0 %vm231_vm3, %v626_v47 }
 0x6ba   :  { %2759 = vmatpush3.msra.mxu0 %v3139_v2  ;;  %2766 = vmatprep.mubr.msk.f32.mxu0 %vm3073_vm2, %v3072_v0 }
 0x6bb   :  { %2760 = vmatprep.subr.mxu0 %v3072_v0 }
 0x6bc   :  { %2761 = vmatpush3.msra.mxu0 %v3153_v5 }
 0x6bd   :  { %2762 = vmatprep.subr.mxu0 %v3072_v0 }
 0x6be   :  { %2763 = vmatpush3.msra.mxu0 %v3161_v6 }
 0x6bf   :  { %2764 = vmatprep.subr.mxu0 %v3072_v0 }
 0x6c0   :  { %2765 = vmatpush3.msra.mxu0 %v3169_v7 }
 0x6c1   :  { %2767 = vmatmul.mubr.msk.f32.vlgmr.msra.gmra.mxu0 %vm231_vm3, %v626_v47  ;;  %2780 = vmatprep.subr.mxu0 %v3072_v0 }
 0x6c2   :  { %2781 = vmatpush3.msra.mxu0 %v3209_v33  ;;  %2788 = vmatprep.mubr.msk.f32.mxu0 %vm3073_vm2, %v3072_v0 }
 0x6c3   :  { %2782 = vmatprep.subr.mxu0 %v3072_v0 }
 0x6c4   :  { %2783 = vmatpush3.msra.mxu0 %v3215_v34 }
 0x6c5   :  { %2784 = vmatprep.subr.mxu0 %v3072_v0 }
 0x6c6   :  { %2785 = vmatpush3.msra.mxu0 %v3226_v36 }
 0x6c7   :  { %2786 = vmatprep.subr.mxu0 %v3072_v0 }
 0x6c8   :  { %2787 = vmatpush3.msra.mxu0 %v3245_v40 }
 0x6c9   :  { %2802 = vmatprep.subr.mxu0 %v3072_v0 }
 0x6d2   :  { %v521_v57 = vpop.permute.xlu0 %520 }
 0x6d3   :  { %523 = vst.msk [vmem:[%s3796_s10] sm:$0xff] %vm231_vm3, %v521_v57  ;;  %2756 = vmatmul.mubr.msk.f32.vlgmr.msra.gmra.mxu1 %vm231_vm3, %v521_v57 }
 0x6d4   :  { %2770 = vmatpush3.msra.mxu1 %v3231_v37  ;;  %2777 = vmatprep.mubr.msk.f32.mxu1 %vm3073_vm2, %v3072_v0 }
 0x6d5   :  { %2771 = vmatprep.subr.mxu1 %v3072_v0 }
 0x6d6   :  { %2772 = vmatpush3.msra.mxu1 %v3253_v41 }
 0x6d7   :  { %2773 = vmatprep.subr.mxu1 %v3072_v0 }
 0x6d8   :  { %2774 = vmatpush3.msra.mxu1 %v3266_v45 }
 0x6d9   :  { %2775 = vmatprep.subr.mxu1 %v3072_v0 }
 0x6da   :  { %2776 = vmatpush3.msra.mxu1 %v3275_v46 }
 0x6db   :  { %2791 = vmatprep.subr.mxu1 %v3072_v0 }
 0x779   :  { %v695_v58 = vpop.f32.mrf.mxu0 }
 0x77a   :  { %v696_v12 = vadd.f32 %v3348_v8, %v695_v58 }
 0x77b   :  { %v2746_v59 = vpop.f32.mrf.mxu0 }
 0x781   :  { %v872_v60 = vpop.f32.mrf.mxu0 }
 0x782   :  { %v873_v62 = vadd.f32 %v3192_v14, %v872_v60  ;;  %v1086_v60 = vld [vmem:[#allocation2 + $0x18] sm:$0xff] }
 0x783   :  { %v2768_v63 = vpop.f32.mrf.mxu0 }
 0x784   :  { %884 = vrot.lane.b32.xlu1 %v873_v62, %s3074_s4  ;;  %v876_v10 = vadd.f32 %v873_v62, %v805_v9 }
 0x786   :  { %v2520_v11 = vmul.f32 -1.442695, %v876_v10 }
 0x788   :  { %2979 = vpow2.f32 %v2520_v11 }
 0x793   :  { %v767_v1 = vpop.f32.mrf.mxu1 }
 0x794   :  { %v768_v3 = vadd.f32 %v3316_v61, %v767_v1 }
 0x795   :  { %v2757_v4 = vpop.f32.mrf.mxu1  ;;  %v2980_v15 = vpop.eup %2979 }
 0x796   :  { %779 = vrot.lane.b32.xlu0 %v768_v3, %s3074_s4  ;;  %v771_v13 = vadd.f32 %v768_v3, %v696_v12  ;;  %v880_v17 = vadd.f32 1.0, %v2980_v15 }
 0x798   :  { %v2518_v16 = vmul.f32 -1.442695, %v771_v13 }
 0x79a   :  { %2981 = vpow2.f32 %v2518_v16 }
 0x79b   :  { %2983 = vrcp.f32 %v880_v17 }
 0x7a7   :  { %v2982_v18 = vpop.eup %2981 }
 0x7a8   :  { %v2984_v19 = vpop.eup %2983  ;;  %v775_v21 = vadd.f32 1.0, %v2982_v18 }
 0x7aa   :  { %2985 = vrcp.f32 %v775_v21 }
 0x7b7   :  { %v2986_v23 = vpop.eup %2985 }
 0x7f6   :  { %v885_v20 = vpop.permute.xlu1 %884 }
 0x7f7   :  { %v887_v22 = vmul.f32 %v2984_v19, %v885_v20 }
 0x7f9   :  { %889 = vrot.lane.b32.xlu1 %v887_v22, %s3074_s4 }
 0x808   :  { %v780_v24 = vpop.permute.xlu0 %779 }
 0x809   :  { %v782_v25 = vmul.f32 %v2986_v23, %v780_v24 }
 0x80b   :  { %784 = vrot.lane.b32.xlu0 %v782_v25, %s3074_s4 }
 0x86b   :  { %v890_v26 = vpop.permute.xlu1 %889 }
 0x86c   :  { %v892_v27 = vadd.f32 %v890_v26, %v805_v9 }
 0x86e   :  { %2987 = vtanh.f32 %v892_v27 }
 0x87b   :  { %v2988_v28 = vpop.eup %2987 }
 0x87c   :  { %v894_v29 = vsub.f32 %v3362_v55, %v2988_v28 }
 0x87d   :  { %v785_v30 = vpop.permute.xlu0 %784 }
 0x87e   :  { %896 = vrot.lane.b32.xlu1 %v894_v29, %s3076_s24  ;;  %v787_v31 = vadd.f32 %v785_v30, %v696_v12 }
 0x880   :  { %2989 = vtanh.f32 %v787_v31 }
 0x88d   :  { %v2990_v32 = vpop.eup %2989 }
 0x88e   :  { %v789_v35 = vsub.f32 %v3366_v56, %v2990_v32 }
 0x890   :  { %791 = vrot.lane.b32.xlu0 %v789_v35, %s3076_s24 }
 0x8f0   :  { %v897_v38 = vpop.permute.xlu1 %896 }
 0x8f1   :  { %v899_v39 = vmul.f32 %v2984_v19, %v897_v38 }
 0x8f3   :  { %901 = vrot.lane.b32.xlu1 %v899_v39, %s3075_s12 }
 0x902   :  { %v792_v42 = vpop.permute.xlu0 %791 }
 0x903   :  { %v794_v43 = vmul.f32 %v2986_v23, %v792_v42 }
 0x905   :  { %796 = vrot.lane.b32.xlu0 %v794_v43, %s3075_s12 }
 0x965   :  { %v902_v44 = vpop.permute.xlu1 %901 }
 0x966   :  { %v3420_v48 = vadd.f32 %v2988_v28, %v902_v44 }
 0x968   :  { %906 = vrot.lane.b32.xlu1 %v3420_v48, %s3074_s4 }
 0x977   :  { %v797_v50 = vpop.permute.xlu0 %796 }
 0x978   :  { %v3424_v51 = vadd.f32 %v2990_v32, %v797_v50 }
 0x97a   :  { %801 = vrot.lane.b32.xlu0 %v3424_v51, %s3074_s4 }
 0x9da   :  { %v907_v52 = vpop.permute.xlu1 %906 }
 0x9db   :  { %2778 = vmatmul.mubr.msk.f32.vlgmr.msra.gmra.mxu1 %vm231_vm3, %v907_v52 }
 0x9dc   :  { %2792 = vmatpush3.msra.mxu1 %v3139_v2  ;;  %2799 = vmatprep.mubr.msk.f32.mxu1 %vm3073_vm2, %v3072_v0 }
 0x9dd   :  { %2793 = vmatprep.subr.mxu1 %v3072_v0 }
 0x9de   :  { %2794 = vmatpush3.msra.mxu1 %v3153_v5 }
 0x9df   :  { %2795 = vmatprep.subr.mxu1 %v3072_v0 }
 0x9e0   :  { %2796 = vmatpush3.msra.mxu1 %v3161_v6 }
 0x9e1   :  { %2797 = vmatprep.subr.mxu1 %v3072_v0 }
 0x9e2   :  { %2798 = vmatpush3.msra.mxu1 %v3169_v7 }
 0x9e3   :  { %2800 = vmatmul.mubr.msk.f32.vlgmr.msra.gmra.mxu1 %vm231_vm3, %v907_v52  ;;  %2813 = vmatprep.subr.mxu1 %v3072_v0 }
 0x9e4   :  { %2814 = vmatpush3.msra.mxu1 %v3209_v33  ;;  %2821 = vmatprep.mubr.msk.f32.mxu1 %vm3073_vm2, %v3072_v0 }
 0x9e5   :  { %2815 = vmatprep.subr.mxu1 %v3072_v0 }
 0x9e6   :  { %2816 = vmatpush3.msra.mxu1 %v3215_v34 }
 0x9e7   :  { %2817 = vmatprep.subr.mxu1 %v3072_v0 }
 0x9e8   :  { %2818 = vmatpush3.msra.mxu1 %v3226_v36 }
 0x9e9   :  { %2819 = vmatprep.subr.mxu1 %v3072_v0 }
 0x9ea   :  { %2820 = vmatpush3.msra.mxu1 %v3245_v40 }
 0x9eb   :  { %2835 = vmatprep.subr.mxu1 %v3072_v0 }
 0x9ec   :  { %v802_v53 = vpop.permute.xlu0 %801 }
 0x9ed   :  { %804 = vst.msk [vmem:[%s3796_s10 + $0x8] sm:$0xff] %vm231_vm3, %v802_v53  ;;  %2789 = vmatmul.mubr.msk.f32.vlgmr.msra.gmra.mxu0 %vm231_vm3, %v802_v53 }
 0x9ee   :  { %2803 = vmatpush3.msra.mxu0 %v3231_v37  ;;  %2810 = vmatprep.mubr.msk.f32.mxu0 %vm3073_vm2, %v3072_v0 }
 0x9ef   :  { %2804 = vmatprep.subr.mxu0 %v3072_v0 }
 0x9f0   :  { %2805 = vmatpush3.msra.mxu0 %v3253_v41 }
 0x9f1   :  { %2806 = vmatprep.subr.mxu0 %v3072_v0 }
 0x9f2   :  { %2807 = vmatpush3.msra.mxu0 %v3266_v45 }
 0x9f3   :  { %2808 = vmatprep.subr.mxu0 %v3072_v0 }
 0x9f4   :  { %2809 = vmatpush3.msra.mxu0 %v3275_v46 }
 0x9f5   :  { %2824 = vmatprep.subr.mxu0 %v3072_v0 }
 0xa9b   :  { %v976_v54 = vpop.f32.mrf.mxu1 }
 0xa9c   :  { %v977_v1 = vadd.f32 %v3348_v8, %v976_v54 }
 0xa9d   :  { %v2779_v55 = vpop.f32.mrf.mxu1 }
 0xaa3   :  { %v1153_v49 = vpop.f32.mrf.mxu1 }
 0xaa4   :  { %v1154_v56 = vadd.f32 %v3192_v14, %v1153_v49  ;;  %v1367_v49 = vld [vmem:[#allocation2 + $0x20] sm:$0xff] }
 0xaa5   :  { %v2801_v47 = vpop.f32.mrf.mxu1 }
 0xaa6   :  { %1165 = vrot.lane.b32.xlu1 %v1154_v56, %s3074_s4  ;;  %v1157_v62 = vadd.f32 %v1154_v56, %v1086_v60 }
 0xaa8   :  { %v2525_v63 = vmul.f32 -1.442695, %v1157_v62 }
 0xaaa   :  { %2991 = vpow2.f32 %v2525_v63 }
 0xaad   :  { %v1048_v57 = vpop.f32.mrf.mxu0 }
 0xaae   :  { %v1049_v58 = vadd.f32 %v3316_v61, %v1048_v57 }
 0xaaf   :  { %v2790_v59 = vpop.f32.mrf.mxu0 }
 0xab0   :  { %1060 = vrot.lane.b32.xlu0 %v1049_v58, %s3074_s4  ;;  %v1052_v3 = vadd.f32 %v1049_v58, %v977_v1 }
 0xab2   :  { %v2523_v4 = vmul.f32 -1.442695, %v1052_v3 }
 0xab4   :  { %2993 = vpow2.f32 %v2523_v4 }
 0xab7   :  { %v2992_v9 = vpop.eup %2991 }
 0xab8   :  { %v1161_v10 = vadd.f32 1.0, %v2992_v9 }
 0xaba   :  { %2995 = vrcp.f32 %v1161_v10 }
 0xac1   :  { %v2994_v11 = vpop.eup %2993 }
 0xac2   :  { %v1056_v12 = vadd.f32 1.0, %v2994_v11 }
 0xac4   :  { %2997 = vrcp.f32 %v1056_v12 }
 0xac7   :  { %v2996_v13 = vpop.eup %2995 }
 0xad1   :  { %v2998_v17 = vpop.eup %2997 }
 0xb18   :  { %v1166_v15 = vpop.permute.xlu1 %1165 }
 0xb19   :  { %v1168_v16 = vmul.f32 %v2996_v13, %v1166_v15 }
 0xb1b   :  { %1170 = vrot.lane.b32.xlu1 %v1168_v16, %s3074_s4 }
 0xb22   :  { %v1061_v18 = vpop.permute.xlu0 %1060 }
 0xb23   :  { %v1063_v19 = vmul.f32 %v2998_v17, %v1061_v18 }
 0xb25   :  { %1065 = vrot.lane.b32.xlu0 %v1063_v19, %s3074_s4 }
 0xb8d   :  { %v1171_v20 = vpop.permute.xlu1 %1170 }
 0xb8e   :  { %v1173_v21 = vadd.f32 %v1171_v20, %v1086_v60 }
 0xb90   :  { %2999 = vtanh.f32 %v1173_v21 }
 0xb97   :  { %v1066_v22 = vpop.permute.xlu0 %1065 }
 0xb98   :  { %v1068_v23 = vadd.f32 %v1066_v22, %v977_v1 }
 0xb9a   :  { %3001 = vtanh.f32 %v1068_v23 }
 0xb9d   :  { %v3000_v24 = vpop.eup %2999 }
 0xb9e   :  { %v1175_v25 = vsub.f32 %v3420_v48, %v3000_v24 }
 0xba0   :  { %1177 = vrot.lane.b32.xlu1 %v1175_v25, %s3076_s24 }
 0xba7   :  { %v3002_v26 = vpop.eup %3001 }
 0xba8   :  { %v1070_v27 = vsub.f32 %v3424_v51, %v3002_v26 }
 0xbaa   :  { %1072 = vrot.lane.b32.xlu0 %v1070_v27, %s3076_s24 }
 0xc12   :  { %v1178_v28 = vpop.permute.xlu1 %1177 }
 0xc13   :  { %v1180_v29 = vmul.f32 %v2996_v13, %v1178_v28 }
 0xc15   :  { %1182 = vrot.lane.b32.xlu1 %v1180_v29, %s3075_s12 }
 0xc1c   :  { %v1073_v30 = vpop.permute.xlu0 %1072 }
 0xc1d   :  { %v1075_v31 = vmul.f32 %v2998_v17, %v1073_v30 }
 0xc1f   :  { %1077 = vrot.lane.b32.xlu0 %v1075_v31, %s3075_s12 }
 0xc87   :  { %v1183_v32 = vpop.permute.xlu1 %1182 }
 0xc88   :  { %v3478_v35 = vadd.f32 %v3000_v24, %v1183_v32 }
 0xc8a   :  { %1187 = vrot.lane.b32.xlu1 %v3478_v35, %s3074_s4 }
 0xc91   :  { %v1078_v38 = vpop.permute.xlu0 %1077 }
 0xc92   :  { %v3482_v39 = vadd.f32 %v3002_v26, %v1078_v38 }
 0xc94   :  { %1082 = vrot.lane.b32.xlu0 %v3482_v39, %s3074_s4 }
 0xcfc   :  { %v1188_v42 = vpop.permute.xlu1 %1187 }
 0xcfd   :  { %2811 = vmatmul.mubr.msk.f32.vlgmr.msra.gmra.mxu0 %vm231_vm3, %v1188_v42 }
 0xcfe   :  { %2825 = vmatpush3.msra.mxu0 %v3139_v2  ;;  %2832 = vmatprep.mubr.msk.f32.mxu0 %vm3073_vm2, %v3072_v0 }
 0xcff   :  { %2826 = vmatprep.subr.mxu0 %v3072_v0 }
 0xd00   :  { %2827 = vmatpush3.msra.mxu0 %v3153_v5 }
 0xd01   :  { %2828 = vmatprep.subr.mxu0 %v3072_v0 }
 0xd02   :  { %2829 = vmatpush3.msra.mxu0 %v3161_v6 }
 0xd03   :  { %2830 = vmatprep.subr.mxu0 %v3072_v0 }
 0xd04   :  { %2831 = vmatpush3.msra.mxu0 %v3169_v7 }
 0xd05   :  { %2833 = vmatmul.mubr.msk.f32.vlgmr.msra.gmra.mxu0 %vm231_vm3, %v1188_v42  ;;  %2846 = vmatprep.subr.mxu0 %v3072_v0 }
 0xd06   :  { %v1083_v43 = vpop.permute.xlu0 %1082  ;;  %2847 = vmatpush3.msra.mxu0 %v3209_v33  ;;  %2854 = vmatprep.mubr.msk.f32.mxu0 %vm3073_vm2, %v3072_v0 }
 0xd07   :  { %1085 = vst.msk [vmem:[%s3796_s10 + $0x10] sm:$0xff] %vm231_vm3, %v1083_v43  ;;  %2822 = vmatmul.mubr.msk.f32.vlgmr.msra.gmra.mxu1 %vm231_vm3, %v1083_v43  ;;  %2848 = vmatprep.subr.mxu0 %v3072_v0 }
 0xd08   :  { %2836 = vmatpush3.msra.mxu1 %v3231_v37  ;;  %2843 = vmatprep.mubr.msk.f32.mxu1 %vm3073_vm2, %v3072_v0 }
 0xd09   :  { %2837 = vmatprep.subr.mxu1 %v3072_v0  ;;  %2849 = vmatpush3.msra.mxu0 %v3215_v34 }
 0xd0a   :  { %2838 = vmatpush3.msra.mxu1 %v3253_v41  ;;  %2850 = vmatprep.subr.mxu0 %v3072_v0 }
 0xd0b   :  { %2839 = vmatprep.subr.mxu1 %v3072_v0  ;;  %2851 = vmatpush3.msra.mxu0 %v3226_v36 }
 0xd0c   :  { %2840 = vmatpush3.msra.mxu1 %v3266_v45  ;;  %2852 = vmatprep.subr.mxu0 %v3072_v0 }
 0xd0d   :  { %2841 = vmatprep.subr.mxu1 %v3072_v0  ;;  %2853 = vmatpush3.msra.mxu0 %v3245_v40 }
 0xd0e   :  { %2842 = vmatpush3.msra.mxu1 %v3275_v46  ;;  %2868 = vmatprep.subr.mxu0 %v3072_v0 }
 0xd0f   :  { %2857 = vmatprep.subr.mxu1 %v3072_v0 }
 0xdbd   :  { %v1257_v44 = vpop.f32.mrf.mxu0 }
 0xdbe   :  { %v1258_v56 = vadd.f32 %v3348_v8, %v1257_v44 }
 0xdbf   :  { %v2812_v48 = vpop.f32.mrf.mxu0 }
 0xdc5   :  { %v1434_v50 = vpop.f32.mrf.mxu0 }
 0xdc6   :  { %v1435_v51 = vadd.f32 %v3192_v14, %v1434_v50 }
 0xdc7   :  { %v2834_v52 = vpop.f32.mrf.mxu0  ;;  %v1329_v53 = vpop.f32.mrf.mxu1 }
 0xdc8   :  { %1446 = vrot.lane.b32.xlu0 %v1435_v51, %s3074_s4  ;;  %v1330_v54 = vadd.f32 %v3316_v61, %v1329_v53  ;;  %v1438_v47 = vadd.f32 %v1435_v51, %v1367_v49 }
 0xdc9   :  { %v2823_v55 = vpop.f32.mrf.mxu1 }
 0xdca   :  { %1341 = vrot.lane.b32.xlu1 %v1330_v54, %s3074_s4  ;;  %v1333_v57 = vadd.f32 %v1330_v54, %v1258_v56  ;;  %v2530_v58 = vmul.f32 -1.442695, %v1438_v47 }
 0xdcc   :  { %v2528_v59 = vmul.f32 -1.442695, %v1333_v57  ;;  %3003 = vpow2.f32 %v2530_v58 }
 0xdce   :  { %3005 = vpow2.f32 %v2528_v59 }
 0xdd9   :  { %v3004_v60 = vpop.eup %3003 }
 0xdda   :  { %v1442_v63 = vadd.f32 1.0, %v3004_v60 }
 0xddb   :  { %v3006_v62 = vpop.eup %3005 }
 0xddc   :  { %v1337_v1 = vadd.f32 1.0, %v3006_v62  ;;  %3007 = vrcp.f32 %v1442_v63 }
 0xdde   :  { %3009 = vrcp.f32 %v1337_v1 }
 0xde9   :  { %v3008_v3 = vpop.eup %3007 }
 0xdeb   :  { %v3010_v10 = vpop.eup %3009 }
 0xe3a   :  { %v1447_v4 = vpop.permute.xlu0 %1446 }
 0xe3b   :  { %v1449_v9 = vmul.f32 %v3008_v3, %v1447_v4 }
 0xe3c   :  { %v1342_v11 = vpop.permute.xlu1 %1341 }
 0xe3d   :  { %1451 = vrot.lane.b32.xlu0 %v1449_v9, %s3074_s4  ;;  %v1344_v12 = vmul.f32 %v3010_v10, %v1342_v11 }
 0xe3f   :  { %1346 = vrot.lane.b32.xlu1 %v1344_v12, %s3074_s4 }
 0xeaf   :  { %v1452_v13 = vpop.permute.xlu0 %1451 }
 0xeb0   :  { %v1454_v15 = vadd.f32 %v1452_v13, %v1367_v49 }
 0xeb1   :  { %v1347_v16 = vpop.permute.xlu1 %1346 }
 0xeb2   :  { %3011 = vtanh.f32 %v1454_v15  ;;  %v1349_v17 = vadd.f32 %v1347_v16, %v1258_v56 }
 0xeb4   :  { %3013 = vtanh.f32 %v1349_v17  ;;  %v3652_v17 = vld [vmem:[%s3792_s7 + $0x18] sm:$0xff] }
 0xebf   :  { %v3012_v18 = vpop.eup %3011 }
 0xec0   :  { %v1456_v19 = vsub.f32 %v3478_v35, %v3012_v18 }
 0xec1   :  { %v3014_v20 = vpop.eup %3013 }
 0xec2   :  { %1458 = vrot.lane.b32.xlu0 %v1456_v19, %s3076_s24  ;;  %v1351_v21 = vsub.f32 %v3482_v39, %v3014_v20  ;;  %v1648_v39 = vld [vmem:[#allocation2 + $0x28] sm:$0xff] }
 0xec3   :  { %v3668_v19 = vld [vmem:[%s3792_s7 + $0x8] sm:$0xff] }
 0xec4   :  { %1353 = vrot.lane.b32.xlu1 %v1351_v21, %s3076_s24 }
 0xf34   :  { %v1459_v22 = vpop.permute.xlu0 %1458 }
 0xf35   :  { %v1461_v23 = vmul.f32 %v3008_v3, %v1459_v22 }
 0xf36   :  { %v1354_v24 = vpop.permute.xlu1 %1353 }
 0xf37   :  { %1463 = vrot.lane.b32.xlu0 %v1461_v23, %s3075_s12  ;;  %v1356_v25 = vmul.f32 %v3010_v10, %v1354_v24 }
 0xf39   :  { %1358 = vrot.lane.b32.xlu1 %v1356_v25, %s3075_s12 }
 0xfa9   :  { %v1464_v26 = vpop.permute.xlu0 %1463 }
 0xfaa   :  { %v3536_v27 = vadd.f32 %v3012_v18, %v1464_v26  ;;  %v3661_v18 = vld [vmem:[%s3792_s7 + $0x10] sm:$0xff] }
 0xfab   :  { %v1359_v28 = vpop.permute.xlu1 %1358 }
 0xfac   :  { %1468 = vrot.lane.b32.xlu0 %v3536_v27, %s3074_s4  ;;  %v3540_v29 = vadd.f32 %v3014_v20, %v1359_v28  ;;  %v3675_v20 = vld [vmem:[%s3792_s7] sm:$0xff] }
 0xfae   :  { %1363 = vrot.lane.b32.xlu1 %v3540_v29, %s3074_s4 }
0x101e   :  { %v1469_v30 = vpop.permute.xlu0 %1468 }
0x101f   :  { %2844 = vmatmul.mubr.msk.f32.vlgmr.msra.gmra.mxu1 %vm231_vm3, %v1469_v30 }
0x1020   :  { %2858 = vmatpush3.msra.mxu1 %v3139_v2  ;;  %v1364_v31 = vpop.permute.xlu1 %1363  ;;  %2865 = vmatprep.mubr.msk.f32.mxu1 %vm3073_vm2, %v3072_v0 }
0x1021   :  { %2859 = vmatprep.subr.mxu1 %v3072_v0  ;;  %1366 = vst.msk [vmem:[%s3796_s10 + $0x18] sm:$0xff] %vm231_vm3, %v1364_v31  ;;  %2855 = vmatmul.mubr.msk.f32.vlgmr.msra.gmra.mxu0 %vm231_vm3, %v1364_v31 }
0x1022   :  { %2860 = vmatpush3.msra.mxu1 %v3153_v5  ;;  %2869 = vmatpush3.msra.mxu0 %v3231_v37 }
0x1023   :  { %2861 = vmatprep.subr.mxu1 %v3072_v0  ;;  %2870 = vmatprep.subr.mxu0 %v3072_v0 }
0x1024   :  { %2862 = vmatpush3.msra.mxu1 %v3161_v6  ;;  %2871 = vmatpush3.msra.mxu0 %v3253_v41 }
0x1025   :  { %2863 = vmatprep.subr.mxu1 %v3072_v0  ;;  %2872 = vmatprep.subr.mxu0 %v3072_v0 }
0x1026   :  { %2864 = vmatpush3.msra.mxu1 %v3169_v7  ;;  %2873 = vmatpush3.msra.mxu0 %v3266_v45 }
0x1027   :  { %2866 = vmatmul.mubr.msk.f32.vlgmr.msra.gmra.mxu1 %vm231_vm3, %v1469_v30  ;;  %2879 = vmatprep.subr.mxu1 %v3072_v0 }
0x1028   :  { %2880 = vmatpush3.msra.mxu1 %v3209_v33  ;;  %2874 = vmatprep.subr.mxu0 %v3072_v0 }
0x1029   :  { %2881 = vmatprep.subr.mxu1 %v3072_v0  ;;  %2875 = vmatpush3.msra.mxu0 %v3275_v46 }
0x102a   :  { %2882 = vmatpush3.msra.mxu1 %v3215_v34  ;;  %2887 = vmatprep.mubr.msk.f32.mxu1 %vm3073_vm2, %v3072_v0 }
0x102b   :  { %2883 = vmatprep.subr.mxu1 %v3072_v0  ;;  %2876 = vmatprep.mubr.msk.f32.mxu0 %vm3073_vm2, %v3072_v0 }
0x102c   :  { %2884 = vmatpush3.msra.mxu1 %v3226_v36  ;;  %2890 = vmatprep.subr.mxu0 %v3072_v0 }
0x102d   :  { %2885 = vmatprep.subr.mxu1 %v3072_v0 }
0x102e   :  { %2886 = vmatpush3.msra.mxu1 %v3245_v40 }
0x102f   :  { %2901 = vmatprep.subr.mxu1 %v3072_v0 }
0x10df   :  { %v1538_v2 = vpop.f32.mrf.mxu1 }
0x10e0   :  { %v1539_v35 = vadd.f32 %v3348_v8, %v1538_v2  ;;  %v1929_v2 = vld [vmem:[#allocation2 + $0x30] sm:$0xff] }
0x10e1   :  { %v2845_v5 = vpop.f32.mrf.mxu1  ;;  %v1610_v6 = vpop.f32.mrf.mxu0 }
0x10e2   :  { %v1611_v7 = vadd.f32 %v3316_v61, %v1610_v6 }
0x10e3   :  { %v2856_v33 = vpop.f32.mrf.mxu0 }
0x10e4   :  { %1622 = vrot.lane.b32.xlu1 %v1611_v7, %s3074_s4  ;;  %v1614_v38 = vadd.f32 %v1611_v7, %v1539_v35 }
0x10e6   :  { %v2533_v40 = vmul.f32 -1.442695, %v1614_v38 }
0x10e7   :  { %v1715_v34 = vpop.f32.mrf.mxu1 }
0x10e8   :  { %v1716_v32 = vadd.f32 %v3192_v14, %v1715_v34  ;;  %3015 = vpow2.f32 %v2533_v40 }
0x10e9   :  { %v2867_v36 = vpop.f32.mrf.mxu1 }
0x10ea   :  { %1727 = vrot.lane.b32.xlu0 %v1716_v32, %s3074_s4  ;;  %v1719_v42 = vadd.f32 %v1716_v32, %v1648_v39 }
0x10ec   :  { %v2535_v43 = vmul.f32 -1.442695, %v1719_v42 }
0x10ee   :  { %3017 = vpow2.f32 %v2535_v43 }
0x10f5   :  { %v3016_v44 = vpop.eup %3015 }
0x10f6   :  { %v1618_v48 = vadd.f32 1.0, %v3016_v44 }
0x10f8   :  { %3019 = vrcp.f32 %v1618_v48 }
0x10fb   :  { %v3018_v50 = vpop.eup %3017 }
0x10fc   :  { %v1723_v51 = vadd.f32 1.0, %v3018_v50 }
0x10fe   :  { %3021 = vrcp.f32 %v1723_v51 }
0x1105   :  { %v3020_v52 = vpop.eup %3019 }
0x110b   :  { %v3022_v54 = vpop.eup %3021 }
0x1156   :  { %v1623_v14 = vpop.permute.xlu1 %1622 }
0x1157   :  { %v1625_v53 = vmul.f32 %v3020_v52, %v1623_v14 }
0x1159   :  { %1627 = vrot.lane.b32.xlu1 %v1625_v53, %s3074_s4 }
0x115c   :  { %v1728_v55 = vpop.permute.xlu0 %1727 }
0x115d   :  { %v1730_v49 = vmul.f32 %v3022_v54, %v1728_v55 }
0x115f   :  { %1732 = vrot.lane.b32.xlu0 %v1730_v49, %s3074_s4 }
0x11cb   :  { %v1628_v56 = vpop.permute.xlu1 %1627 }
0x11cc   :  { %v1630_v47 = vadd.f32 %v1628_v56, %v1539_v35 }
0x11ce   :  { %3023 = vtanh.f32 %v1630_v47 }
0x11d1   :  { %v1733_v57 = vpop.permute.xlu0 %1732 }
0x11d2   :  { %v1735_v58 = vadd.f32 %v1733_v57, %v1648_v39 }
0x11d4   :  { %3025 = vtanh.f32 %v1735_v58 }
0x11db   :  { %v3024_v59 = vpop.eup %3023 }
0x11dc   :  { %v1632_v60 = vsub.f32 %v3540_v29, %v3024_v59 }
0x11de   :  { %1634 = vrot.lane.b32.xlu1 %v1632_v60, %s3076_s24  ;;  %v3066_v60 = vld [vmem:[%s3793_s6 + $0x18] sm:$0xff] }
0x11e1   :  { %v3026_v62 = vpop.eup %3025 }
0x11e2   :  { %v1737_v63 = vsub.f32 %v3536_v27, %v3026_v62  ;;  %v3684_v27 = vld [vmem:[%s3791_s5] ss:$0 sm:$0xff] }
0x11e4   :  { %1739 = vrot.lane.b32.xlu0 %v1737_v63, %s3076_s24  ;;  %v3068_v63 = vld [vmem:[%s3793_s6 + $0x8] sm:$0xff] }
0x1250   :  { %v1635_v1 = vpop.permute.xlu1 %1634 }
0x1251   :  { %v1637_v3 = vmul.f32 %v3020_v52, %v1635_v1  ;;  %v3069_v1 = vld [vmem:[%s3793_s6] sm:$0xff] }
0x1253   :  { %1639 = vrot.lane.b32.xlu1 %v1637_v3, %s3075_s12 }
0x1256   :  { %v1740_v4 = vpop.permute.xlu0 %1739 }
0x1257   :  { %v1742_v9 = vmul.f32 %v3022_v54, %v1740_v4 }
0x1259   :  { %1744 = vrot.lane.b32.xlu0 %v1742_v9, %s3075_s12  ;;  %v3751_v9 = vld [vmem:[%s3794_s9] ss:$0 sm:$0xff] }
0x12c5   :  { %v1640_v10 = vpop.permute.xlu1 %1639 }
0x12c6   :  { %v3594_v11 = vadd.f32 %v3024_v59, %v1640_v10 }
0x12c8   :  { %1644 = vrot.lane.b32.xlu1 %v3594_v11, %s3074_s4 }
0x12cb   :  { %v1745_v12 = vpop.permute.xlu0 %1744 }
0x12cc   :  { %v3598_v13 = vadd.f32 %v3026_v62, %v1745_v12  ;;  %v3067_v62 = vld [vmem:[%s3793_s6 + $0x10] sm:$0xff] }
0x12ce   :  { %1749 = vrot.lane.b32.xlu0 %v3598_v13, %s3074_s4 }
0x133a   :  { %v1645_v15 = vpop.permute.xlu1 %1644 }
0x133b   :  { %1647 = vst.msk [vmem:[%s3796_s10 + $0x20] sm:$0xff] %vm231_vm3, %v1645_v15  ;;  %2888 = vmatmul.mubr.msk.f32.vlgmr.msra.gmra.mxu1 %vm231_vm3, %v1645_v15 }
0x133c   :  { %2902 = vmatpush3.msra.mxu1 %v3231_v37  ;;  %2909 = vmatprep.mubr.msk.f32.mxu1 %vm3073_vm2, %v3072_v0  ;;  %v3619_v37 = vld [vmem:[%s3787_s3 + $0x18] sm:$0xff] }
0x133d   :  { %2903 = vmatprep.subr.mxu1 %v3072_v0 }
0x133e   :  { %2904 = vmatpush3.msra.mxu1 %v3253_v41  ;;  %v3629_v41 = vld [vmem:[%s3787_s3 + $0x10] sm:$0xff] }
0x133f   :  { %2905 = vmatprep.subr.mxu1 %v3072_v0 }
0x1340   :  { %v1750_v16 = vpop.permute.xlu0 %1749  ;;  %2906 = vmatpush3.msra.mxu1 %v3266_v45  ;;  %v3637_v45 = vld [vmem:[%s3787_s3 + $0x8] sm:$0xff] }
0x1341   :  { %2877 = vmatmul.mubr.msk.f32.vlgmr.msra.gmra.mxu0 %vm231_vm3, %v1750_v16  ;;  %2907 = vmatprep.subr.mxu1 %v3072_v0 }
0x1342   :  { %2891 = vmatpush3.msra.mxu0 %v3619_v37  ;;  %2898 = vmatprep.mubr.msk.f32.mxu0 %vm3073_vm2, %v3072_v0 }
0x1343   :  { %2892 = vmatprep.subr.mxu0 %v3072_v0  ;;  %2908 = vmatpush3.msra.mxu1 %v3275_v46  ;;  %v3644_v46 = vld [vmem:[%s3787_s3] sm:$0xff] }
0x1344   :  { %2893 = vmatpush3.msra.mxu0 %v3629_v41  ;;  %2923 = vmatprep.subr.mxu1 %v3072_v0 }
0x1345   :  { %2894 = vmatprep.subr.mxu0 %v3072_v0 }
0x1346   :  { %2895 = vmatpush3.msra.mxu0 %v3637_v45 }
0x1347   :  { %2896 = vmatprep.subr.mxu0 %v3072_v0 }
0x1348   :  { %2897 = vmatpush3.msra.mxu0 %v3644_v46 }
0x1349   :  { %2899 = vmatmul.mubr.msk.f32.vlgmr.msra.gmra.mxu0 %vm231_vm3, %v1750_v16  ;;  %2912 = vmatprep.subr.mxu0 %v3072_v0 }
0x134a   :  { %2913 = vmatpush3.msra.mxu0 %v3652_v17  ;;  %2920 = vmatprep.mubr.msk.f32.mxu0 %vm3073_vm2, %v3072_v0 }
0x134b   :  { %2914 = vmatprep.subr.mxu0 %v3072_v0 }
0x134c   :  { %2915 = vmatpush3.msra.mxu0 %v3661_v18 }
0x134d   :  { %2916 = vmatprep.subr.mxu0 %v3072_v0 }
0x134e   :  { %2917 = vmatpush3.msra.mxu0 %v3668_v19 }
0x134f   :  { %2918 = vmatprep.subr.mxu0 %v3072_v0 }
0x1350   :  { %2919 = vmatpush3.msra.mxu0 %v3675_v20 }
0x1351   :  { %2934 = vmatprep.subr.mxu0 %v3072_v0 }
0x13fb   :  { %v1891_v21 = vpop.f32.mrf.mxu1 }
0x13fc   :  { %v1892_v22 = vadd.f32 %v3316_v61, %v1891_v21 }
0x13fd   :  { %v2889_v23 = vpop.f32.mrf.mxu1 }
0x13fe   :  { %1903 = vrot.lane.b32.xlu1 %v1892_v22, %s3074_s4 }
0x1401   :  { %v1819_v24 = vpop.f32.mrf.mxu0 }
0x1402   :  { %v1820_v30 = vadd.f32 %v3348_v8, %v1819_v24 }
0x1403   :  { %v2878_v25 = vpop.f32.mrf.mxu0 }
0x1404   :  { %v1895_v31 = vadd.f32 %v1892_v22, %v1820_v30 }
0x1406   :  { %v2538_v61 = vmul.f32 -1.442695, %v1895_v31 }
0x1408   :  { %3027 = vpow2.f32 %v2538_v61 }
0x1409   :  { %v1996_v26 = vpop.f32.mrf.mxu0 }
0x140a   :  { %v1997_v28 = vadd.f32 %v3684_v27, %v1996_v26 }
0x140b   :  { %v2900_v29 = vpop.f32.mrf.mxu0 }
0x140c   :  { %2008 = vrot.lane.b32.xlu0 %v1997_v28, %s3074_s4  ;;  %v2000_v5 = vadd.f32 %v1997_v28, %v1929_v2 }
0x140e   :  { %v2540_v6 = vmul.f32 -1.442695, %v2000_v5 }
0x1410   :  { %3029 = vpow2.f32 %v2540_v6 }
0x1415   :  { %v3028_v7 = vpop.eup %3027 }
0x1416   :  { %v1899_v33 = vadd.f32 1.0, %v3028_v7 }
0x1418   :  { %3031 = vrcp.f32 %v1899_v33 }
0x141d   :  { %v3030_v34 = vpop.eup %3029 }
0x141e   :  { %v2004_v32 = vadd.f32 1.0, %v3030_v34 }
0x1420   :  { %3033 = vrcp.f32 %v2004_v32 }
0x1425   :  { %v3032_v36 = vpop.eup %3031 }
0x142d   :  { %v3034_v40 = vpop.eup %3033 }
0x1470   :  { %v1904_v35 = vpop.permute.xlu1 %1903 }
0x1471   :  { %v1906_v38 = vmul.f32 %v3032_v36, %v1904_v35 }
0x1473   :  { %1908 = vrot.lane.b32.xlu1 %v1906_v38, %s3074_s4 }
0x147e   :  { %v2009_v8 = vpop.permute.xlu0 %2008 }
0x147f   :  { %v2011_v39 = vmul.f32 %v3034_v40, %v2009_v8 }
0x1481   :  { %2013 = vrot.lane.b32.xlu0 %v2011_v39, %s3074_s4 }
0x14e5   :  { %v1909_v42 = vpop.permute.xlu1 %1908 }
0x14e6   :  { %v1911_v43 = vadd.f32 %v1909_v42, %v1820_v30 }
0x14e8   :  { %3035 = vtanh.f32 %v1911_v43 }
0x14f3   :  { %v2014_v44 = vpop.permute.xlu0 %2013 }
0x14f4   :  { %v2016_v48 = vadd.f32 %v2014_v44, %v1929_v2 }
0x14f5   :  { %v3036_v50 = vpop.eup %3035 }
0x14f6   :  { %3037 = vtanh.f32 %v2016_v48  ;;  %v1913_v51 = vsub.f32 %v3594_v11, %v3036_v50 }
0x14f8   :  { %1915 = vrot.lane.b32.xlu1 %v1913_v51, %s3076_s24 }
0x1503   :  { %v3038_v52 = vpop.eup %3037 }
0x1504   :  { %v2018_v14 = vsub.f32 %v3598_v13, %v3038_v52 }
0x1506   :  { %2020 = vrot.lane.b32.xlu0 %v2018_v14, %s3076_s24 }
0x156a   :  { %v1916_v53 = vpop.permute.xlu1 %1915 }
0x156b   :  { %v1918_v54 = vmul.f32 %v3032_v36, %v1916_v53 }
0x156d   :  { %1920 = vrot.lane.b32.xlu1 %v1918_v54, %s3075_s12 }
0x1578   :  { %v2021_v55 = vpop.permute.xlu0 %2020 }
0x1579   :  { %v2023_v49 = vmul.f32 %v3034_v40, %v2021_v55 }
0x157b   :  { %2025 = vrot.lane.b32.xlu0 %v2023_v49, %s3075_s12 }
0x15df   :  { %v1921_v56 = vpop.permute.xlu1 %1920 }
0x15e0   :  { %v3697_v47 = vadd.f32 %v3036_v50, %v1921_v56 }
0x15e2   :  { %1925 = vrot.lane.b32.xlu1 %v3697_v47, %s3074_s4 }
0x15ed   :  { %v2026_v57 = vpop.permute.xlu0 %2025 }
0x15ee   :  { %v3701_v58 = vadd.f32 %v3038_v52, %v2026_v57 }
0x15f0   :  { %2030 = vrot.lane.b32.xlu0 %v3701_v58, %s3074_s4 }
0x1654   :  { %v1926_v59 = vpop.permute.xlu1 %1925 }
0x1655   :  { %1928 = vst.msk [vmem:[%s3796_s10 + $0x28] sm:$0xff] %vm231_vm3, %v1926_v59  ;;  %2921 = vmatmul.mubr.msk.f32.vlgmr.msra.gmra.mxu0 %vm231_vm3, %v1926_v59 }
0x1656   :  { %2935 = vmatpush3.msra.mxu0 %v3066_v60  ;;  %2942 = vmatprep.mubr.msk.f32.mxu0 %vm3073_vm2, %v3072_v0 }
0x1657   :  { %2936 = vmatprep.subr.mxu0 %v3072_v0 }
0x1658   :  { %2937 = vmatpush3.msra.mxu0 %v3067_v62 }
0x1659   :  { %2938 = vmatprep.subr.mxu0 %v3072_v0 }
0x165a   :  { %2939 = vmatpush3.msra.mxu0 %v3068_v63 }
0x165b   :  { %2940 = vmatprep.subr.mxu0 %v3072_v0 }
0x165c   :  { %2941 = vmatpush3.msra.mxu0 %v3069_v1 }
0x1662   :  { %v2031_v3 = vpop.permute.xlu0 %2030 }
0x1663   :  { %2910 = vmatmul.mubr.msk.f32.vlgmr.msra.gmra.mxu1 %vm231_vm3, %v2031_v3 }
0x1664   :  { %2924 = vmatpush3.msra.mxu1 %v3619_v37  ;;  %2931 = vmatprep.mubr.msk.f32.mxu1 %vm3073_vm2, %v3072_v0 }
0x1665   :  { %2925 = vmatprep.subr.mxu1 %v3072_v0 }
0x1666   :  { %2926 = vmatpush3.msra.mxu1 %v3629_v41 }
0x1667   :  { %2927 = vmatprep.subr.mxu1 %v3072_v0 }
0x1668   :  { %2928 = vmatpush3.msra.mxu1 %v3637_v45 }
0x1669   :  { %2929 = vmatprep.subr.mxu1 %v3072_v0 }
0x166a   :  { %2930 = vmatpush3.msra.mxu1 %v3644_v46 }
0x166b   :  { %2932 = vmatmul.mubr.msk.f32.vlgmr.msra.gmra.mxu1 %vm231_vm3, %v2031_v3  ;;  %2945 = vmatprep.subr.mxu1 %v3072_v0 }
0x166c   :  { %2946 = vmatpush3.msra.mxu1 %v3652_v17  ;;  %2953 = vmatprep.mubr.msk.f32.mxu1 %vm3073_vm2, %v3072_v0 }
0x166d   :  { %2947 = vmatprep.subr.mxu1 %v3072_v0 }
0x166e   :  { %2948 = vmatpush3.msra.mxu1 %v3661_v18  ;;  %v2210_v18 = vld [vmem:[#allocation2 + $0x38] sm:$0xff] }
0x166f   :  { %2949 = vmatprep.subr.mxu1 %v3072_v0 }
0x1670   :  { %2950 = vmatpush3.msra.mxu1 %v3668_v19 }
0x1671   :  { %2951 = vmatprep.subr.mxu1 %v3072_v0  ;;  %v3071_v0 = vld [vmem:[%s3795_s8] ss:$0 sm:$0xff] }
0x1672   :  { %2952 = vmatpush3.msra.mxu1 %v3675_v20 }
0x1715   :  { %v2172_v4 = vpop.f32.mrf.mxu0 }
0x1716   :  { %v2173_v10 = vadd.f32 %v3751_v9, %v2172_v4 }
0x1717   :  { %v2922_v11 = vpop.f32.mrf.mxu0 }
0x1718   :  { %2184 = vrot.lane.b32.xlu1 %v2173_v10, %s3074_s4 }
0x1723   :  { %v2100_v12 = vpop.f32.mrf.mxu1 }
0x1724   :  { %v2101_v41 = vadd.f32 %v3071_v0, %v2100_v12 }
0x1725   :  { %v2911_v13 = vpop.f32.mrf.mxu1 }
0x1726   :  { %v2176_v45 = vadd.f32 %v2173_v10, %v2101_v41 }
0x1728   :  { %v2543_v46 = vmul.f32 -1.442695, %v2176_v45 }
0x172a   :  { %3039 = vpow2.f32 %v2543_v46 }
0x172b   :  { %v2277_v15 = vpop.f32.mrf.mxu1 }
0x172c   :  { %v2278_v16 = vadd.f32 %v3684_v27, %v2277_v15 }
0x172d   :  { %v2933_v37 = vpop.f32.mrf.mxu1 }
0x172e   :  { %2289 = vrot.lane.b32.xlu0 %v2278_v16, %s3074_s4  ;;  %v2281_v19 = vadd.f32 %v2278_v16, %v2210_v18 }
0x1730   :  { %v2545_v21 = vmul.f32 -1.442695, %v2281_v19 }
0x1737   :  { %v3040_v17 = vpop.eup %3039 }
0x1738   :  { %v2180_v20 = vadd.f32 1.0, %v3040_v17 }
0x173a   :  { %3041 = vrcp.f32 %v2180_v20 }
0x173b   :  { %3043 = vpow2.f32 %v2545_v21 }
0x1747   :  { %v3042_v22 = vpop.eup %3041 }
0x1748   :  { %v3044_v25 = vpop.eup %3043 }
0x1749   :  { %v2285_v26 = vadd.f32 1.0, %v3044_v25 }
0x174b   :  { %3045 = vrcp.f32 %v2285_v26 }
0x1758   :  { %v3046_v27 = vpop.eup %3045 }
0x178a   :  { %v2185_v23 = vpop.permute.xlu1 %2184 }
0x178b   :  { %v2187_v24 = vmul.f32 %v3042_v22, %v2185_v23 }
0x178d   :  { %2189 = vrot.lane.b32.xlu1 %v2187_v24, %s3074_s4 }
0x17a0   :  { %v2290_v28 = vpop.permute.xlu0 %2289 }
0x17a1   :  { %v2292_v29 = vmul.f32 %v3046_v27, %v2290_v28 }
0x17a3   :  { %2294 = vrot.lane.b32.xlu0 %v2292_v29, %s3074_s4 }
0x17ff   :  { %v2190_v30 = vpop.permute.xlu1 %2189 }
0x1800   :  { %v2192_v31 = vadd.f32 %v2190_v30, %v2101_v41 }
0x1802   :  { %3047 = vtanh.f32 %v2192_v31 }
0x180f   :  { %v3048_v61 = vpop.eup %3047 }
0x1810   :  { %v2194_v2 = vsub.f32 %v3697_v47, %v3048_v61 }
0x1812   :  { %2196 = vrot.lane.b32.xlu1 %v2194_v2, %s3076_s24 }
0x1815   :  { %v2295_v5 = vpop.permute.xlu0 %2294 }
0x1816   :  { %v2297_v6 = vadd.f32 %v2295_v5, %v2210_v18 }
0x1818   :  { %3049 = vtanh.f32 %v2297_v6 }
0x1825   :  { %v3050_v7 = vpop.eup %3049 }
0x1826   :  { %v2299_v33 = vsub.f32 %v3701_v58, %v3050_v7 }
0x1828   :  { %2301 = vrot.lane.b32.xlu0 %v2299_v33, %s3076_s24 }
0x1884   :  { %v2197_v34 = vpop.permute.xlu1 %2196 }
0x1885   :  { %v2199_v32 = vmul.f32 %v3042_v22, %v2197_v34 }
0x1887   :  { %2201 = vrot.lane.b32.xlu1 %v2199_v32, %s3075_s12 }
0x189a   :  { %v2302_v36 = vpop.permute.xlu0 %2301 }
0x189b   :  { %v2304_v35 = vmul.f32 %v3046_v27, %v2302_v36 }
0x189d   :  { %2306 = vrot.lane.b32.xlu0 %v2304_v35, %s3075_s12 }
0x18f9   :  { %v2202_v38 = vpop.permute.xlu1 %2201 }
0x18fa   :  { %v2204_v40 = vadd.f32 %v3048_v61, %v2202_v38 }
0x18fc   :  { %2206 = vrot.lane.b32.xlu1 %v2204_v40, %s3074_s4 }
0x190f   :  { %v2307_v8 = vpop.permute.xlu0 %2306 }
0x1910   :  { %v2309_v39 = vadd.f32 %v3050_v7, %v2307_v8 }
0x1912   :  { %2311 = vrot.lane.b32.xlu0 %v2309_v39, %s3074_s4 }
0x196e   :  { %v2207_v42 = vpop.permute.xlu1 %2206 }
0x196f   :  { %2209 = vst.msk [vmem:[%s3796_s10 + $0x30] sm:$0xff] %vm231_vm3, %v2207_v42  ;;  %2954 = vmatmul.mubr.msk.f32.vlgmr.msra.gmra.mxu1 %vm231_vm3, %v2207_v42 }
0x1984   :  { %v2312_v43 = vpop.permute.xlu0 %2311 }
0x1985   :  { %2943 = vmatmul.mubr.msk.f32.vlgmr.msra.gmra.mxu0 %vm231_vm3, %v2312_v43 }
0x1a2f   :  { %v2453_v44 = vpop.f32.mrf.mxu1 }
0x1a30   :  { %v2454_v48 = vadd.f32 %v3751_v9, %v2453_v44 }
0x1a31   :  { %v2955_v50 = vpop.f32.mrf.mxu1 }
0x1a32   :  { %2465 = vrot.lane.b32.xlu1 %v2454_v48, %s3074_s4 }
0x1a45   :  { %v2381_v51 = vpop.f32.mrf.mxu0 }
0x1a46   :  { %v2382_v14 = vadd.f32 %v3071_v0, %v2381_v51 }
0x1a47   :  { %v2944_v52 = vpop.f32.mrf.mxu0 }
0x1a48   :  { %v2457_v53 = vadd.f32 %v2454_v48, %v2382_v14 }
0x1a4a   :  { %v2548_v54 = vmul.f32 -1.442695, %v2457_v53 }
0x1a4c   :  { %3051 = vpow2.f32 %v2548_v54 }
0x1a59   :  { %v3052_v55 = vpop.eup %3051 }
0x1a5a   :  { %v2461_v49 = vadd.f32 1.0, %v3052_v55 }
0x1a5c   :  { %3053 = vrcp.f32 %v2461_v49 }
0x1a69   :  { %v3054_v56 = vpop.eup %3053 }
0x1aa4   :  { %v2466_v47 = vpop.permute.xlu1 %2465 }
0x1aa5   :  { %v2468_v57 = vmul.f32 %v3054_v56, %v2466_v47 }
0x1aa7   :  { %2470 = vrot.lane.b32.xlu0 %v2468_v57, %s3074_s4 }
0x1b19   :  { %v2471_v58 = vpop.permute.xlu0 %2470 }
0x1b1a   :  { %v2473_v59 = vadd.f32 %v2471_v58, %v2382_v14 }
0x1b1c   :  { %3055 = vtanh.f32 %v2473_v59 }
0x1b29   :  { %v3056_v60 = vpop.eup %3055 }
0x1b2a   :  { %v2475_v62 = vsub.f32 %v2204_v40, %v3056_v60 }
0x1b2c   :  { %2477 = vrot.lane.b32.xlu1 %v2475_v62, %s3076_s24 }
0x1b9e   :  { %v2478_v63 = vpop.permute.xlu1 %2477 }
0x1b9f   :  { %v2480_v1 = vmul.f32 %v3054_v56, %v2478_v63 }
0x1ba1   :  { %2482 = vrot.lane.b32.xlu0 %v2480_v1, %s3075_s12 }
0x1c13   :  { %v2483_v3 = vpop.permute.xlu0 %2482 }
0x1c14   :  { %v2485_v4 = vadd.f32 %v3056_v60, %v2483_v3 }
0x1c16   :  { %2487 = vrot.lane.b32.xlu1 %v2485_v4, %s3074_s4 }
0x1c88   :  { %v2488_v9 = vpop.permute.xlu1 %2487 }
0x1c89   :  { %2490 = vst.msk [vmem:[%s3796_s10 + $0x38] sm:$0xff] %vm231_vm3, %v2488_v9 }

</bundles_post_ra>
